<compile_context>
chip_gen: v7x
topology: tpu7x:2x2x1
jax: 0.10.0
libtpu: 0.0.40
codegen_flags: <defaults>
</compile_context>

<pallas_src>
import functools

import jax
import jax.numpy as jnp
import numpy as np
from jax import lax
from jax.experimental import pallas as pl


# ----------------------------- fused network kernel --------------------------
def _fused_lstm_net_kernel(x_ref, wi0_ref, wh0_ref, b0_ref,
                           wi1_ref, wh1_ref, b1_ref, wo_ref, bo_ref,
                           out_ref, *, T, H):
    """Everything VMEM-resident; single invocation (no grid).

    x_ref : (B, T, D)   batch-first input
    wi0   : (D, 4H) = W_ih_l0^T     wh0: (H, 4H) = W_hh_l0^T    b0: (1, 4H)
    wi1   : (H, 4H) = W_ih_l1^T     wh1: (H, 4H) = W_hh_l1^T    b1: (1, 4H)
    wo    : (H, O)                  bo : (1, O)
    out_ref: (B, O) final logits only.
    """
    B = x_ref.shape[0]
    D = x_ref.shape[2]
    G = 4 * H

    # ---- constants hoisted out of the unrolled recurrence (items 4 & 5) ----
    lane = lax.broadcasted_iota(jnp.int32, (B, G), 1)
    is_g = (lane >= 2 * H) & (lane < 3 * H)
    pre = jnp.where(is_g, 1.0, 0.5).astype(jnp.float32)   # *0.5 on sigmoid lanes
    post = jnp.where(is_g, 0.0, 0.5).astype(jnp.float32)  # +0.5 on sigmoid lanes

    def cell(gates, c_prev):
        """gates: (B, 4H) pre-activation (i|f|g|o) -> (h_new, c_new)."""
        # Single transcendental pass over the gate vreg: tanh on the g lanes,
        # sigmoid = 0.5*(1 + tanh(x/2)) on the i/f/o lanes.
        t = jnp.tanh(gates * pre)
        acts = t * pre + post
        i = acts[:, 0 * H:1 * H]
        f = acts[:, 1 * H:2 * H]
        g = acts[:, 2 * H:3 * H]
        o = acts[:, 3 * H:4 * H]
        c_new = f * c_prev + i * g
        h_new = o * jnp.tanh(c_new)
        return h_new, c_new

    # ---- layer-0 input projection hoisted out of the time loop (item 2) ----
    # (B, T, D) -> (B*T, D) is a tile-aligned (layout no-op) merge for T == 8.
    x_flat = x_ref[...].reshape(B * T, D)
    xp = jnp.dot(x_flat, wi0_ref[...],
                 preferred_element_type=jnp.float32) + b0_ref[...]
    xp = xp.reshape(B, T, G)            # xp[:, t, :] is a static slice per step

    wh0 = wh0_ref[...]
    wi1 = wi1_ref[...]
    wh1 = wh1_ref[...]
    b1 = b1_ref[...]

    zeros = jnp.zeros((B, H), jnp.float32)
    h0, c0, h1, c1 = zeros, zeros, zeros, zeros

    # Static Python unroll over time: t is concrete, all offsets static.
    for t in range(T):
        # Layer 0: only the recurrent matmul sits on the serial critical path.
        g0 = xp[:, t, :] + jnp.dot(h0, wh0, preferred_element_type=jnp.float32)
        h0, c0 = cell(g0, c0)
        # Layer 1: two accumulating matmuls instead of a per-step lane concat.
        g1 = (jnp.dot(h0, wi1, preferred_element_type=jnp.float32)
              + jnp.dot(h1, wh1, preferred_element_type=jnp.float32) + b1)
        h1, c1 = cell(g1, c1)

    # Final Linear on the last-timestep hidden of the top layer.
    out_ref[...] = (jnp.dot(h1, wo_ref[...], preferred_element_type=jnp.float32)
                    + bo_ref[...])


# ------------------------------ param preparation ----------------------------
def prepare_params(params):
    """One-time weight prep (transpose / bias-combine), outside the jitted fwd."""
    wi0 = params["w_ih_l0"].T                                 # (D, 4H)
    wh0 = params["w_hh_l0"].T                                 # (H, 4H)
    b0 = (params["b_ih_l0"] + params["b_hh_l0"])[None, :]     # (1, 4H)
    wi1 = params["w_ih_l1"].T                                 # (H, 4H)
    wh1 = params["w_hh_l1"].T                                 # (H, 4H)
    b1 = (params["b_ih_l1"] + params["b_hh_l1"])[None, :]     # (1, 4H)
    wo = params["w_out"].T                                    # (H, O)
    bo = params["b_out"][None, :]                             # (1, O)
    return tuple(jnp.asarray(a, jnp.float32)
                 for a in (wi0, wh0, b0, wi1, wh1, b1, wo, bo))


# --------------------------------- forward -----------------------------------
@jax.jit
def lstm_net_forward(x_bf, wi0, wh0, b0, wi1, wh1, b1, wo, bo):
    """x_bf: (B, T, input_size) batch-first. Returns (B, output_dim)."""
    B, T, D = x_bf.shape
    H = wh0.shape[0]
    O = wo.shape[1]

    kernel = functools.partial(_fused_lstm_net_kernel, T=T, H=H)

    flops = (T * 2 * B * 4 * H * (D + H)        # layer 0 (input proj + recurrent)
             + T * 2 * B * 4 * H * (2 * H)      # layer 1
             + 2 * B * H * O)                   # output linear
    transcendentals = T * 2 * B * 5 * H         # one 4H tanh + one H tanh / cell
    bytes_accessed = 4 * (x_bf.size + wi0.size + wh0.size + b0.size + wi1.size
                          + wh1.size + b1.size + wo.size + bo.size + B * O)

    # Grid-less call: full-array blocks (exempt from the (8,128) divisibility
    # rule), everything lands in VMEM, only the (B, O) logits leave.
    return pl.pallas_call(
        kernel,
        out_shape=jax.ShapeDtypeStruct((B, O), jnp.float32),
        in_specs=[
            pl.BlockSpec((B, T, D), lambda: (0, 0, 0)),
            pl.BlockSpec(wi0.shape, lambda: (0, 0)),
            pl.BlockSpec(wh0.shape, lambda: (0, 0)),
            pl.BlockSpec(b0.shape, lambda: (0, 0)),
            pl.BlockSpec(wi1.shape, lambda: (0, 0)),
            pl.BlockSpec(wh1.shape, lambda: (0, 0)),
            pl.BlockSpec(b1.shape, lambda: (0, 0)),
            pl.BlockSpec(wo.shape, lambda: (0, 0)),
            pl.BlockSpec(bo.shape, lambda: (0, 0)),
        ],
        out_specs=pl.BlockSpec((B, O), lambda: (0, 0)),
        cost_estimate=pl.CostEstimate(
            flops=flops,
            transcendentals=transcendentals,
            bytes_accessed=bytes_accessed),
    )(x_bf, wi0, wh0, b0, wi1, wh1, b1, wo, bo)


# -------------------------- Pure-JAX reference -------------------------------
def _lstm_layer_ref(x_tm, w_ih, w_hh, b_ih, b_hh):
    T, B, _ = x_tm.shape
    H = w_hh.shape[1]

    def step(carry, x_t):
        h, c = carry
        gates = x_t @ w_ih.T + h @ w_hh.T + b_ih + b_hh
        i = jax.nn.sigmoid(gates[:, 0 * H:1 * H])
        f = jax.nn.sigmoid(gates[:, 1 * H:2 * H])
        g = jnp.tanh(gates[:, 2 * H:3 * H])
        o = jax.nn.sigmoid(gates[:, 3 * H:4 * H])
        c = f * c + i * g
        h = o * jnp.tanh(c)
        return (h, c), h

    init = (jnp.zeros((B, H), jnp.float32), jnp.zeros((B, H), jnp.float32))
    _, hs = jax.lax.scan(step, init, x_tm)
    return hs


def lstm_net_ref(x_bf, p):
    x_tm = jnp.transpose(x_bf, (1, 0, 2))
    h0 = _lstm_layer_ref(x_tm, p["w_ih_l0"], p["w_hh_l0"], p["b_ih_l0"], p["b_hh_l0"])
    h1 = _lstm_layer_ref(h0, p["w_ih_l1"], p["w_hh_l1"], p["b_ih_l1"], p["b_hh_l1"])
    return h1[-1] @ p["w_out"].T + p["b_out"]


# ---------------------------------- Main -------------------------------------
if __name__ == "__main__":
    B, T = 2, 8
    INPUT_SIZE, HIDDEN_SIZE, OUTPUT_DIM = 16, 32, 10

    key = jax.random.PRNGKey(0)
    ks = jax.random.split(key, 12)
    scale = 1.0 / np.sqrt(HIDDEN_SIZE)

    params = {
        "w_ih_l0": jax.random.uniform(ks[0], (4 * HIDDEN_SIZE, INPUT_SIZE),
                                      jnp.float32, -scale, scale),
        "w_hh_l0": jax.random.uniform(ks[1], (4 * HIDDEN_SIZE, HIDDEN_SIZE),
                                      jnp.float32, -scale, scale),
        "b_ih_l0": jax.random.uniform(ks[2], (4 * HIDDEN_SIZE,),
                                      jnp.float32, -scale, scale),
        "b_hh_l0": jax.random.uniform(ks[3], (4 * HIDDEN_SIZE,),
                                      jnp.float32, -scale, scale),
        "w_ih_l1": jax.random.uniform(ks[4], (4 * HIDDEN_SIZE, HIDDEN_SIZE),
                                      jnp.float32, -scale, scale),
        "w_hh_l1": jax.random.uniform(ks[5], (4 * HIDDEN_SIZE, HIDDEN_SIZE),
                                      jnp.float32, -scale, scale),
        "b_ih_l1": jax.random.uniform(ks[6], (4 * HIDDEN_SIZE,),
                                      jnp.float32, -scale, scale),
        "b_hh_l1": jax.random.uniform(ks[7], (4 * HIDDEN_SIZE,),
                                      jnp.float32, -scale, scale),
        "w_out": jax.random.uniform(ks[8], (OUTPUT_DIM, HIDDEN_SIZE),
                                    jnp.float32, -scale, scale),
        "b_out": jax.random.uniform(ks[9], (OUTPUT_DIM,),
                                    jnp.float32, -scale, scale),
    }

    x = jax.random.normal(ks[10], (B, T, INPUT_SIZE), jnp.float32)

    prepared = prepare_params(params)   # one-time weight prep (outside jit)
    out = lstm_net_forward(x, *prepared)
    out = jax.block_until_ready(out)

    ref = lstm_net_ref(x, params)
    # sigmoid is computed as 0.5*(1+tanh(x/2)) inside the kernel (algebraically
    # exact, rounding differs slightly) -> keep rtol tight, small atol slack.
    np.testing.assert_allclose(np.asarray(out), np.asarray(ref),
                               rtol=1e-5, atol=3e-5)
    assert out.shape == (B, OUTPUT_DIM)
    print("KERNEL_OK")
</pallas_src>

<mosaic_0001>
module attributes {stable_mosaic.version = 11 : i64} {
  func.func @_fused_lstm_net_kernel(%arg0: memref<2x8x16xf32, #tpu.memory_space<vmem>>, %arg1: memref<16x128xf32, #tpu.memory_space<vmem>>, %arg2: memref<32x128xf32, #tpu.memory_space<vmem>>, %arg3: memref<1x128xf32, #tpu.memory_space<vmem>>, %arg4: memref<32x128xf32, #tpu.memory_space<vmem>>, %arg5: memref<32x128xf32, #tpu.memory_space<vmem>>, %arg6: memref<1x128xf32, #tpu.memory_space<vmem>>, %arg7: memref<32x10xf32, #tpu.memory_space<vmem>>, %arg8: memref<1x10xf32, #tpu.memory_space<vmem>>, %arg9: memref<2x10xf32, #tpu.memory_space<vmem>>) attributes {dimension_semantics = [], scalar_prefetch = 0 : i64, scratch_operands = 0 : i64, tpu.core_type = #tpu.core_type<tc>} {
    %0 = tpu.iota {dimensions = array<i32: 1>} : vector<2x128xi32>
    %c64_i32 = arith.constant 64 : i32
    %1 = vector.broadcast %c64_i32 : i32 to vector<2x128xi32>
    %2 = arith.cmpi sge, %0, %1 : vector<2x128xi32>
    %c96_i32 = arith.constant 96 : i32
    %3 = vector.broadcast %c96_i32 : i32 to vector<2x128xi32>
    %4 = arith.cmpi slt, %0, %3 : vector<2x128xi32>
    %5 = arith.andi %2, %4 : vector<2x128xi1>
    %cst = arith.constant 1.000000e+00 : f32
    %cst_0 = arith.constant 5.000000e-01 : f32
    %6 = vector.broadcast %cst : f32 to vector<2x128xf32>
    %7 = vector.broadcast %cst_0 : f32 to vector<2x128xf32>
    %8 = arith.select %5, %6, %7 : vector<2x128xi1>, vector<2x128xf32>
    %cst_1 = arith.constant 0.000000e+00 : f32
    %cst_2 = arith.constant 5.000000e-01 : f32
    %9 = vector.broadcast %cst_1 : f32 to vector<2x128xf32>
    %10 = vector.broadcast %cst_2 : f32 to vector<2x128xf32>
    %11 = arith.select %5, %9, %10 : vector<2x128xi1>, vector<2x128xf32>
    %c0 = arith.constant 0 : index
    %c0_3 = arith.constant 0 : index
    %c0_4 = arith.constant 0 : index
    %12 = vector.load %arg0[%c0, %c0_3, %c0_4] : memref<2x8x16xf32, #tpu.memory_space<vmem>>, vector<2x8x16xf32>
    %13 = vector.shape_cast %12 : vector<2x8x16xf32> to vector<16x16xf32>
    %c0_5 = arith.constant 0 : index
    %c0_6 = arith.constant 0 : index
    %14 = vector.load %arg1[%c0_5, %c0_6] : memref<16x128xf32, #tpu.memory_space<vmem>>, vector<16x128xf32>
    %cst_7 = arith.constant dense<0.000000e+00> : vector<16x128xf32>
    %15 = tpu.matmul %13, %14, %cst_7 {dimension_numbers = #tpu.dot_dimension_numbers<[1], [0], [0], [1], [0, 0, 1, 1], [], []>} : vector<16x16xf32>, vector<16x128xf32>, vector<16x128xf32> -> vector<16x128xf32>
    %c0_8 = arith.constant 0 : index
    %c0_9 = arith.constant 0 : index
    %16 = vector.load %arg3[%c0_8, %c0_9] : memref<1x128xf32, #tpu.memory_space<vmem>>, vector<1x128xf32>
    %17 = vector.broadcast %16 : vector<1x128xf32> to vector<16x128xf32>
    %18 = arith.addf %15, %17 : vector<16x128xf32>
    %19 = vector.shape_cast %18 : vector<16x128xf32> to vector<2x8x128xf32>
    %c0_10 = arith.constant 0 : index
    %c0_11 = arith.constant 0 : index
    %20 = vector.load %arg2[%c0_10, %c0_11] : memref<32x128xf32, #tpu.memory_space<vmem>>, vector<32x128xf32>
    %c0_12 = arith.constant 0 : index
    %c0_13 = arith.constant 0 : index
    %21 = vector.load %arg4[%c0_12, %c0_13] : memref<32x128xf32, #tpu.memory_space<vmem>>, vector<32x128xf32>
    %c0_14 = arith.constant 0 : index
    %c0_15 = arith.constant 0 : index
    %22 = vector.load %arg5[%c0_14, %c0_15] : memref<32x128xf32, #tpu.memory_space<vmem>>, vector<32x128xf32>
    %c0_16 = arith.constant 0 : index
    %c0_17 = arith.constant 0 : index
    %23 = vector.load %arg6[%c0_16, %c0_17] : memref<1x128xf32, #tpu.memory_space<vmem>>, vector<1x128xf32>
    %cst_18 = arith.constant 0.000000e+00 : f32
    %24 = vector.broadcast %cst_18 : f32 to vector<2x32xf32>
    %25 = vector.extract_strided_slice %19 {offsets = [0, 0, 0], sizes = [2, 1, 128], strides = [1, 1, 1]} : vector<2x8x128xf32> to vector<2x1x128xf32>
    %26 = vector.shape_cast %25 : vector<2x1x128xf32> to vector<2x128xf32>
    %cst_19 = arith.constant dense<0.000000e+00> : vector<2x128xf32>
    %27 = tpu.matmul %24, %20, %cst_19 {dimension_numbers = #tpu.dot_dimension_numbers<[1], [0], [0], [1], [0, 0, 1, 1], [], []>} : vector<2x32xf32>, vector<32x128xf32>, vector<2x128xf32> -> vector<2x128xf32>
    %28 = arith.addf %26, %27 : vector<2x128xf32>
    %29 = arith.mulf %28, %8 : vector<2x128xf32>
    %30 = math.tanh %29 : vector<2x128xf32>
    %31 = arith.mulf %30, %8 : vector<2x128xf32>
    %32 = arith.addf %31, %11 : vector<2x128xf32>
    %33 = vector.extract_strided_slice %32 {offsets = [0, 0], sizes = [2, 32], strides = [1, 1]} : vector<2x128xf32> to vector<2x32xf32>
    %34 = vector.extract_strided_slice %32 {offsets = [0, 32], sizes = [2, 32], strides = [1, 1]} : vector<2x128xf32> to vector<2x32xf32>
    %35 = vector.extract_strided_slice %32 {offsets = [0, 64], sizes = [2, 32], strides = [1, 1]} : vector<2x128xf32> to vector<2x32xf32>
    %36 = vector.extract_strided_slice %32 {offsets = [0, 96], sizes = [2, 32], strides = [1, 1]} : vector<2x128xf32> to vector<2x32xf32>
    %37 = arith.mulf %34, %24 : vector<2x32xf32>
    %38 = arith.mulf %33, %35 : vector<2x32xf32>
    %39 = arith.addf %37, %38 : vector<2x32xf32>
    %40 = math.tanh %39 : vector<2x32xf32>
    %41 = arith.mulf %36, %40 : vector<2x32xf32>
    %cst_20 = arith.constant dense<0.000000e+00> : vector<2x128xf32>
    %42 = tpu.matmul %41, %21, %cst_20 {dimension_numbers = #tpu.dot_dimension_numbers<[1], [0], [0], [1], [0, 0, 1, 1], [], []>} : vector<2x32xf32>, vector<32x128xf32>, vector<2x128xf32> -> vector<2x128xf32>
    %cst_21 = arith.constant dense<0.000000e+00> : vector<2x128xf32>
    %43 = tpu.matmul %24, %22, %cst_21 {dimension_numbers = #tpu.dot_dimension_numbers<[1], [0], [0], [1], [0, 0, 1, 1], [], []>} : vector<2x32xf32>, vector<32x128xf32>, vector<2x128xf32> -> vector<2x128xf32>
    %44 = arith.addf %42, %43 : vector<2x128xf32>
    %45 = vector.broadcast %23 : vector<1x128xf32> to vector<2x128xf32>
    %46 = arith.addf %44, %45 : vector<2x128xf32>
    %47 = arith.mulf %46, %8 : vector<2x128xf32>
    %48 = math.tanh %47 : vector<2x128xf32>
    %49 = arith.mulf %48, %8 : vector<2x128xf32>
    %50 = arith.addf %49, %11 : vector<2x128xf32>
    %51 = vector.extract_strided_slice %50 {offsets = [0, 0], sizes = [2, 32], strides = [1, 1]} : vector<2x128xf32> to vector<2x32xf32>
    %52 = vector.extract_strided_slice %50 {offsets = [0, 32], sizes = [2, 32], strides = [1, 1]} : vector<2x128xf32> to vector<2x32xf32>
    %53 = vector.extract_strided_slice %50 {offsets = [0, 64], sizes = [2, 32], strides = [1, 1]} : vector<2x128xf32> to vector<2x32xf32>
    %54 = vector.extract_strided_slice %50 {offsets = [0, 96], sizes = [2, 32], strides = [1, 1]} : vector<2x128xf32> to vector<2x32xf32>
    %55 = arith.mulf %52, %24 : vector<2x32xf32>
    %56 = arith.mulf %51, %53 : vector<2x32xf32>
    %57 = arith.addf %55, %56 : vector<2x32xf32>
    %58 = math.tanh %57 : vector<2x32xf32>
    %59 = arith.mulf %54, %58 : vector<2x32xf32>
    %60 = vector.extract_strided_slice %19 {offsets = [0, 1, 0], sizes = [2, 1, 128], strides = [1, 1, 1]} : vector<2x8x128xf32> to vector<2x1x128xf32>
    %61 = vector.shape_cast %60 : vector<2x1x128xf32> to vector<2x128xf32>
    %cst_22 = arith.constant dense<0.000000e+00> : vector<2x128xf32>
    %62 = tpu.matmul %41, %20, %cst_22 {dimension_numbers = #tpu.dot_dimension_numbers<[1], [0], [0], [1], [0, 0, 1, 1], [], []>} : vector<2x32xf32>, vector<32x128xf32>, vector<2x128xf32> -> vector<2x128xf32>
    %63 = arith.addf %61, %62 : vector<2x128xf32>
    %64 = arith.mulf %63, %8 : vector<2x128xf32>
    %65 = math.tanh %64 : vector<2x128xf32>
    %66 = arith.mulf %65, %8 : vector<2x128xf32>
    %67 = arith.addf %66, %11 : vector<2x128xf32>
    %68 = vector.extract_strided_slice %67 {offsets = [0, 0], sizes = [2, 32], strides = [1, 1]} : vector<2x128xf32> to vector<2x32xf32>
    %69 = vector.extract_strided_slice %67 {offsets = [0, 32], sizes = [2, 32], strides = [1, 1]} : vector<2x128xf32> to vector<2x32xf32>
    %70 = vector.extract_strided_slice %67 {offsets = [0, 64], sizes = [2, 32], strides = [1, 1]} : vector<2x128xf32> to vector<2x32xf32>
    %71 = vector.extract_strided_slice %67 {offsets = [0, 96], sizes = [2, 32], strides = [1, 1]} : vector<2x128xf32> to vector<2x32xf32>
    %72 = arith.mulf %69, %39 : vector<2x32xf32>
    %73 = arith.mulf %68, %70 : vector<2x32xf32>
    %74 = arith.addf %72, %73 : vector<2x32xf32>
    %75 = math.tanh %74 : vector<2x32xf32>
    %76 = arith.mulf %71, %75 : vector<2x32xf32>
    %cst_23 = arith.constant dense<0.000000e+00> : vector<2x128xf32>
    %77 = tpu.matmul %76, %21, %cst_23 {dimension_numbers = #tpu.dot_dimension_numbers<[1], [0], [0], [1], [0, 0, 1, 1], [], []>} : vector<2x32xf32>, vector<32x128xf32>, vector<2x128xf32> -> vector<2x128xf32>
    %cst_24 = arith.constant dense<0.000000e+00> : vector<2x128xf32>
    %78 = tpu.matmul %59, %22, %cst_24 {dimension_numbers = #tpu.dot_dimension_numbers<[1], [0], [0], [1], [0, 0, 1, 1], [], []>} : vector<2x32xf32>, vector<32x128xf32>, vector<2x128xf32> -> vector<2x128xf32>
    %79 = arith.addf %77, %78 : vector<2x128xf32>
    %80 = vector.broadcast %23 : vector<1x128xf32> to vector<2x128xf32>
    %81 = arith.addf %79, %80 : vector<2x128xf32>
    %82 = arith.mulf %81, %8 : vector<2x128xf32>
    %83 = math.tanh %82 : vector<2x128xf32>
    %84 = arith.mulf %83, %8 : vector<2x128xf32>
    %85 = arith.addf %84, %11 : vector<2x128xf32>
    %86 = vector.extract_strided_slice %85 {offsets = [0, 0], sizes = [2, 32], strides = [1, 1]} : vector<2x128xf32> to vector<2x32xf32>
    %87 = vector.extract_strided_slice %85 {offsets = [0, 32], sizes = [2, 32], strides = [1, 1]} : vector<2x128xf32> to vector<2x32xf32>
    %88 = vector.extract_strided_slice %85 {offsets = [0, 64], sizes = [2, 32], strides = [1, 1]} : vector<2x128xf32> to vector<2x32xf32>
    %89 = vector.extract_strided_slice %85 {offsets = [0, 96], sizes = [2, 32], strides = [1, 1]} : vector<2x128xf32> to vector<2x32xf32>
    %90 = arith.mulf %87, %57 : vector<2x32xf32>
    %91 = arith.mulf %86, %88 : vector<2x32xf32>
    %92 = arith.addf %90, %91 : vector<2x32xf32>
    %93 = math.tanh %92 : vector<2x32xf32>
    %94 = arith.mulf %89, %93 : vector<2x32xf32>
    %95 = vector.extract_strided_slice %19 {offsets = [0, 2, 0], sizes = [2, 1, 128], strides = [1, 1, 1]} : vector<2x8x128xf32> to vector<2x1x128xf32>
    %96 = vector.shape_cast %95 : vector<2x1x128xf32> to vector<2x128xf32>
    %cst_25 = arith.constant dense<0.000000e+00> : vector<2x128xf32>
    %97 = tpu.matmul %76, %20, %cst_25 {dimension_numbers = #tpu.dot_dimension_numbers<[1], [0], [0], [1], [0, 0, 1, 1], [], []>} : vector<2x32xf32>, vector<32x128xf32>, vector<2x128xf32> -> vector<2x128xf32>
    %98 = arith.addf %96, %97 : vector<2x128xf32>
    %99 = arith.mulf %98, %8 : vector<2x128xf32>
    %100 = math.tanh %99 : vector<2x128xf32>
    %101 = arith.mulf %100, %8 : vector<2x128xf32>
    %102 = arith.addf %101, %11 : vector<2x128xf32>
    %103 = vector.extract_strided_slice %102 {offsets = [0, 0], sizes = [2, 32], strides = [1, 1]} : vector<2x128xf32> to vector<2x32xf32>
    %104 = vector.extract_strided_slice %102 {offsets = [0, 32], sizes = [2, 32], strides = [1, 1]} : vector<2x128xf32> to vector<2x32xf32>
    %105 = vector.extract_strided_slice %102 {offsets = [0, 64], sizes = [2, 32], strides = [1, 1]} : vector<2x128xf32> to vector<2x32xf32>
    %106 = vector.extract_strided_slice %102 {offsets = [0, 96], sizes = [2, 32], strides = [1, 1]} : vector<2x128xf32> to vector<2x32xf32>
    %107 = arith.mulf %104, %74 : vector<2x32xf32>
    %108 = arith.mulf %103, %105 : vector<2x32xf32>
    %109 = arith.addf %107, %108 : vector<2x32xf32>
    %110 = math.tanh %109 : vector<2x32xf32>
    %111 = arith.mulf %106, %110 : vector<2x32xf32>
    %cst_26 = arith.constant dense<0.000000e+00> : vector<2x128xf32>
    %112 = tpu.matmul %111, %21, %cst_26 {dimension_numbers = #tpu.dot_dimension_numbers<[1], [0], [0], [1], [0, 0, 1, 1], [], []>} : vector<2x32xf32>, vector<32x128xf32>, vector<2x128xf32> -> vector<2x128xf32>
    %cst_27 = arith.constant dense<0.000000e+00> : vector<2x128xf32>
    %113 = tpu.matmul %94, %22, %cst_27 {dimension_numbers = #tpu.dot_dimension_numbers<[1], [0], [0], [1], [0, 0, 1, 1], [], []>} : vector<2x32xf32>, vector<32x128xf32>, vector<2x128xf32> -> vector<2x128xf32>
    %114 = arith.addf %112, %113 : vector<2x128xf32>
    %115 = vector.broadcast %23 : vector<1x128xf32> to vector<2x128xf32>
    %116 = arith.addf %114, %115 : vector<2x128xf32>
    %117 = arith.mulf %116, %8 : vector<2x128xf32>
    %118 = math.tanh %117 : vector<2x128xf32>
    %119 = arith.mulf %118, %8 : vector<2x128xf32>
    %120 = arith.addf %119, %11 : vector<2x128xf32>
    %121 = vector.extract_strided_slice %120 {offsets = [0, 0], sizes = [2, 32], strides = [1, 1]} : vector<2x128xf32> to vector<2x32xf32>
    %122 = vector.extract_strided_slice %120 {offsets = [0, 32], sizes = [2, 32], strides = [1, 1]} : vector<2x128xf32> to vector<2x32xf32>
    %123 = vector.extract_strided_slice %120 {offsets = [0, 64], sizes = [2, 32], strides = [1, 1]} : vector<2x128xf32> to vector<2x32xf32>
    %124 = vector.extract_strided_slice %120 {offsets = [0, 96], sizes = [2, 32], strides = [1, 1]} : vector<2x128xf32> to vector<2x32xf32>
    %125 = arith.mulf %122, %92 : vector<2x32xf32>
    %126 = arith.mulf %121, %123 : vector<2x32xf32>
    %127 = arith.addf %125, %126 : vector<2x32xf32>
    %128 = math.tanh %127 : vector<2x32xf32>
    %129 = arith.mulf %124, %128 : vector<2x32xf32>
    %130 = vector.extract_strided_slice %19 {offsets = [0, 3, 0], sizes = [2, 1, 128], strides = [1, 1, 1]} : vector<2x8x128xf32> to vector<2x1x128xf32>
    %131 = vector.shape_cast %130 : vector<2x1x128xf32> to vector<2x128xf32>
    %cst_28 = arith.constant dense<0.000000e+00> : vector<2x128xf32>
    %132 = tpu.matmul %111, %20, %cst_28 {dimension_numbers = #tpu.dot_dimension_numbers<[1], [0], [0], [1], [0, 0, 1, 1], [], []>} : vector<2x32xf32>, vector<32x128xf32>, vector<2x128xf32> -> vector<2x128xf32>
    %133 = arith.addf %131, %132 : vector<2x128xf32>
    %134 = arith.mulf %133, %8 : vector<2x128xf32>
    %135 = math.tanh %134 : vector<2x128xf32>
    %136 = arith.mulf %135, %8 : vector<2x128xf32>
    %137 = arith.addf %136, %11 : vector<2x128xf32>
    %138 = vector.extract_strided_slice %137 {offsets = [0, 0], sizes = [2, 32], strides = [1, 1]} : vector<2x128xf32> to vector<2x32xf32>
    %139 = vector.extract_strided_slice %137 {offsets = [0, 32], sizes = [2, 32], strides = [1, 1]} : vector<2x128xf32> to vector<2x32xf32>
    %140 = vector.extract_strided_slice %137 {offsets = [0, 64], sizes = [2, 32], strides = [1, 1]} : vector<2x128xf32> to vector<2x32xf32>
    %141 = vector.extract_strided_slice %137 {offsets = [0, 96], sizes = [2, 32], strides = [1, 1]} : vector<2x128xf32> to vector<2x32xf32>
    %142 = arith.mulf %139, %109 : vector<2x32xf32>
    %143 = arith.mulf %138, %140 : vector<2x32xf32>
    %144 = arith.addf %142, %143 : vector<2x32xf32>
    %145 = math.tanh %144 : vector<2x32xf32>
    %146 = arith.mulf %141, %145 : vector<2x32xf32>
    %cst_29 = arith.constant dense<0.000000e+00> : vector<2x128xf32>
    %147 = tpu.matmul %146, %21, %cst_29 {dimension_numbers = #tpu.dot_dimension_numbers<[1], [0], [0], [1], [0, 0, 1, 1], [], []>} : vector<2x32xf32>, vector<32x128xf32>, vector<2x128xf32> -> vector<2x128xf32>
    %cst_30 = arith.constant dense<0.000000e+00> : vector<2x128xf32>
    %148 = tpu.matmul %129, %22, %cst_30 {dimension_numbers = #tpu.dot_dimension_numbers<[1], [0], [0], [1], [0, 0, 1, 1], [], []>} : vector<2x32xf32>, vector<32x128xf32>, vector<2x128xf32> -> vector<2x128xf32>
    %149 = arith.addf %147, %148 : vector<2x128xf32>
    %150 = vector.broadcast %23 : vector<1x128xf32> to vector<2x128xf32>
    %151 = arith.addf %149, %150 : vector<2x128xf32>
    %152 = arith.mulf %151, %8 : vector<2x128xf32>
    %153 = math.tanh %152 : vector<2x128xf32>
    %154 = arith.mulf %153, %8 : vector<2x128xf32>
    %155 = arith.addf %154, %11 : vector<2x128xf32>
    %156 = vector.extract_strided_slice %155 {offsets = [0, 0], sizes = [2, 32], strides = [1, 1]} : vector<2x128xf32> to vector<2x32xf32>
    %157 = vector.extract_strided_slice %155 {offsets = [0, 32], sizes = [2, 32], strides = [1, 1]} : vector<2x128xf32> to vector<2x32xf32>
    %158 = vector.extract_strided_slice %155 {offsets = [0, 64], sizes = [2, 32], strides = [1, 1]} : vector<2x128xf32> to vector<2x32xf32>
    %159 = vector.extract_strided_slice %155 {offsets = [0, 96], sizes = [2, 32], strides = [1, 1]} : vector<2x128xf32> to vector<2x32xf32>
    %160 = arith.mulf %157, %127 : vector<2x32xf32>
    %161 = arith.mulf %156, %158 : vector<2x32xf32>
    %162 = arith.addf %160, %161 : vector<2x32xf32>
    %163 = math.tanh %162 : vector<2x32xf32>
    %164 = arith.mulf %159, %163 : vector<2x32xf32>
    %165 = vector.extract_strided_slice %19 {offsets = [0, 4, 0], sizes = [2, 1, 128], strides = [1, 1, 1]} : vector<2x8x128xf32> to vector<2x1x128xf32>
    %166 = vector.shape_cast %165 : vector<2x1x128xf32> to vector<2x128xf32>
    %cst_31 = arith.constant dense<0.000000e+00> : vector<2x128xf32>
    %167 = tpu.matmul %146, %20, %cst_31 {dimension_numbers = #tpu.dot_dimension_numbers<[1], [0], [0], [1], [0, 0, 1, 1], [], []>} : vector<2x32xf32>, vector<32x128xf32>, vector<2x128xf32> -> vector<2x128xf32>
    %168 = arith.addf %166, %167 : vector<2x128xf32>
    %169 = arith.mulf %168, %8 : vector<2x128xf32>
    %170 = math.tanh %169 : vector<2x128xf32>
    %171 = arith.mulf %170, %8 : vector<2x128xf32>
    %172 = arith.addf %171, %11 : vector<2x128xf32>
    %173 = vector.extract_strided_slice %172 {offsets = [0, 0], sizes = [2, 32], strides = [1, 1]} : vector<2x128xf32> to vector<2x32xf32>
    %174 = vector.extract_strided_slice %172 {offsets = [0, 32], sizes = [2, 32], strides = [1, 1]} : vector<2x128xf32> to vector<2x32xf32>
    %175 = vector.extract_strided_slice %172 {offsets = [0, 64], sizes = [2, 32], strides = [1, 1]} : vector<2x128xf32> to vector<2x32xf32>
    %176 = vector.extract_strided_slice %172 {offsets = [0, 96], sizes = [2, 32], strides = [1, 1]} : vector<2x128xf32> to vector<2x32xf32>
    %177 = arith.mulf %174, %144 : vector<2x32xf32>
    %178 = arith.mulf %173, %175 : vector<2x32xf32>
    %179 = arith.addf %177, %178 : vector<2x32xf32>
    %180 = math.tanh %179 : vector<2x32xf32>
    %181 = arith.mulf %176, %180 : vector<2x32xf32>
    %cst_32 = arith.constant dense<0.000000e+00> : vector<2x128xf32>
    %182 = tpu.matmul %181, %21, %cst_32 {dimension_numbers = #tpu.dot_dimension_numbers<[1], [0], [0], [1], [0, 0, 1, 1], [], []>} : vector<2x32xf32>, vector<32x128xf32>, vector<2x128xf32> -> vector<2x128xf32>
    %cst_33 = arith.constant dense<0.000000e+00> : vector<2x128xf32>
    %183 = tpu.matmul %164, %22, %cst_33 {dimension_numbers = #tpu.dot_dimension_numbers<[1], [0], [0], [1], [0, 0, 1, 1], [], []>} : vector<2x32xf32>, vector<32x128xf32>, vector<2x128xf32> -> vector<2x128xf32>
    %184 = arith.addf %182, %183 : vector<2x128xf32>
    %185 = vector.broadcast %23 : vector<1x128xf32> to vector<2x128xf32>
    %186 = arith.addf %184, %185 : vector<2x128xf32>
    %187 = arith.mulf %186, %8 : vector<2x128xf32>
    %188 = math.tanh %187 : vector<2x128xf32>
    %189 = arith.mulf %188, %8 : vector<2x128xf32>
    %190 = arith.addf %189, %11 : vector<2x128xf32>
    %191 = vector.extract_strided_slice %190 {offsets = [0, 0], sizes = [2, 32], strides = [1, 1]} : vector<2x128xf32> to vector<2x32xf32>
    %192 = vector.extract_strided_slice %190 {offsets = [0, 32], sizes = [2, 32], strides = [1, 1]} : vector<2x128xf32> to vector<2x32xf32>
    %193 = vector.extract_strided_slice %190 {offsets = [0, 64], sizes = [2, 32], strides = [1, 1]} : vector<2x128xf32> to vector<2x32xf32>
    %194 = vector.extract_strided_slice %190 {offsets = [0, 96], sizes = [2, 32], strides = [1, 1]} : vector<2x128xf32> to vector<2x32xf32>
    %195 = arith.mulf %192, %162 : vector<2x32xf32>
    %196 = arith.mulf %191, %193 : vector<2x32xf32>
    %197 = arith.addf %195, %196 : vector<2x32xf32>
    %198 = math.tanh %197 : vector<2x32xf32>
    %199 = arith.mulf %194, %198 : vector<2x32xf32>
    %200 = vector.extract_strided_slice %19 {offsets = [0, 5, 0], sizes = [2, 1, 128], strides = [1, 1, 1]} : vector<2x8x128xf32> to vector<2x1x128xf32>
    %201 = vector.shape_cast %200 : vector<2x1x128xf32> to vector<2x128xf32>
    %cst_34 = arith.constant dense<0.000000e+00> : vector<2x128xf32>
    %202 = tpu.matmul %181, %20, %cst_34 {dimension_numbers = #tpu.dot_dimension_numbers<[1], [0], [0], [1], [0, 0, 1, 1], [], []>} : vector<2x32xf32>, vector<32x128xf32>, vector<2x128xf32> -> vector<2x128xf32>
    %203 = arith.addf %201, %202 : vector<2x128xf32>
    %204 = arith.mulf %203, %8 : vector<2x128xf32>
    %205 = math.tanh %204 : vector<2x128xf32>
    %206 = arith.mulf %205, %8 : vector<2x128xf32>
    %207 = arith.addf %206, %11 : vector<2x128xf32>
    %208 = vector.extract_strided_slice %207 {offsets = [0, 0], sizes = [2, 32], strides = [1, 1]} : vector<2x128xf32> to vector<2x32xf32>
    %209 = vector.extract_strided_slice %207 {offsets = [0, 32], sizes = [2, 32], strides = [1, 1]} : vector<2x128xf32> to vector<2x32xf32>
    %210 = vector.extract_strided_slice %207 {offsets = [0, 64], sizes = [2, 32], strides = [1, 1]} : vector<2x128xf32> to vector<2x32xf32>
    %211 = vector.extract_strided_slice %207 {offsets = [0, 96], sizes = [2, 32], strides = [1, 1]} : vector<2x128xf32> to vector<2x32xf32>
    %212 = arith.mulf %209, %179 : vector<2x32xf32>
    %213 = arith.mulf %208, %210 : vector<2x32xf32>
    %214 = arith.addf %212, %213 : vector<2x32xf32>
    %215 = math.tanh %214 : vector<2x32xf32>
    %216 = arith.mulf %211, %215 : vector<2x32xf32>
    %cst_35 = arith.constant dense<0.000000e+00> : vector<2x128xf32>
    %217 = tpu.matmul %216, %21, %cst_35 {dimension_numbers = #tpu.dot_dimension_numbers<[1], [0], [0], [1], [0, 0, 1, 1], [], []>} : vector<2x32xf32>, vector<32x128xf32>, vector<2x128xf32> -> vector<2x128xf32>
    %cst_36 = arith.constant dense<0.000000e+00> : vector<2x128xf32>
    %218 = tpu.matmul %199, %22, %cst_36 {dimension_numbers = #tpu.dot_dimension_numbers<[1], [0], [0], [1], [0, 0, 1, 1], [], []>} : vector<2x32xf32>, vector<32x128xf32>, vector<2x128xf32> -> vector<2x128xf32>
    %219 = arith.addf %217, %218 : vector<2x128xf32>
    %220 = vector.broadcast %23 : vector<1x128xf32> to vector<2x128xf32>
    %221 = arith.addf %219, %220 : vector<2x128xf32>
    %222 = arith.mulf %221, %8 : vector<2x128xf32>
    %223 = math.tanh %222 : vector<2x128xf32>
    %224 = arith.mulf %223, %8 : vector<2x128xf32>
    %225 = arith.addf %224, %11 : vector<2x128xf32>
    %226 = vector.extract_strided_slice %225 {offsets = [0, 0], sizes = [2, 32], strides = [1, 1]} : vector<2x128xf32> to vector<2x32xf32>
    %227 = vector.extract_strided_slice %225 {offsets = [0, 32], sizes = [2, 32], strides = [1, 1]} : vector<2x128xf32> to vector<2x32xf32>
    %228 = vector.extract_strided_slice %225 {offsets = [0, 64], sizes = [2, 32], strides = [1, 1]} : vector<2x128xf32> to vector<2x32xf32>
    %229 = vector.extract_strided_slice %225 {offsets = [0, 96], sizes = [2, 32], strides = [1, 1]} : vector<2x128xf32> to vector<2x32xf32>
    %230 = arith.mulf %227, %197 : vector<2x32xf32>
    %231 = arith.mulf %226, %228 : vector<2x32xf32>
    %232 = arith.addf %230, %231 : vector<2x32xf32>
    %233 = math.tanh %232 : vector<2x32xf32>
    %234 = arith.mulf %229, %233 : vector<2x32xf32>
    %235 = vector.extract_strided_slice %19 {offsets = [0, 6, 0], sizes = [2, 1, 128], strides = [1, 1, 1]} : vector<2x8x128xf32> to vector<2x1x128xf32>
    %236 = vector.shape_cast %235 : vector<2x1x128xf32> to vector<2x128xf32>
    %cst_37 = arith.constant dense<0.000000e+00> : vector<2x128xf32>
    %237 = tpu.matmul %216, %20, %cst_37 {dimension_numbers = #tpu.dot_dimension_numbers<[1], [0], [0], [1], [0, 0, 1, 1], [], []>} : vector<2x32xf32>, vector<32x128xf32>, vector<2x128xf32> -> vector<2x128xf32>
    %238 = arith.addf %236, %237 : vector<2x128xf32>
    %239 = arith.mulf %238, %8 : vector<2x128xf32>
    %240 = math.tanh %239 : vector<2x128xf32>
    %241 = arith.mulf %240, %8 : vector<2x128xf32>
    %242 = arith.addf %241, %11 : vector<2x128xf32>
    %243 = vector.extract_strided_slice %242 {offsets = [0, 0], sizes = [2, 32], strides = [1, 1]} : vector<2x128xf32> to vector<2x32xf32>
    %244 = vector.extract_strided_slice %242 {offsets = [0, 32], sizes = [2, 32], strides = [1, 1]} : vector<2x128xf32> to vector<2x32xf32>
    %245 = vector.extract_strided_slice %242 {offsets = [0, 64], sizes = [2, 32], strides = [1, 1]} : vector<2x128xf32> to vector<2x32xf32>
    %246 = vector.extract_strided_slice %242 {offsets = [0, 96], sizes = [2, 32], strides = [1, 1]} : vector<2x128xf32> to vector<2x32xf32>
    %247 = arith.mulf %244, %214 : vector<2x32xf32>
    %248 = arith.mulf %243, %245 : vector<2x32xf32>
    %249 = arith.addf %247, %248 : vector<2x32xf32>
    %250 = math.tanh %249 : vector<2x32xf32>
    %251 = arith.mulf %246, %250 : vector<2x32xf32>
    %cst_38 = arith.constant dense<0.000000e+00> : vector<2x128xf32>
    %252 = tpu.matmul %251, %21, %cst_38 {dimension_numbers = #tpu.dot_dimension_numbers<[1], [0], [0], [1], [0, 0, 1, 1], [], []>} : vector<2x32xf32>, vector<32x128xf32>, vector<2x128xf32> -> vector<2x128xf32>
    %cst_39 = arith.constant dense<0.000000e+00> : vector<2x128xf32>
    %253 = tpu.matmul %234, %22, %cst_39 {dimension_numbers = #tpu.dot_dimension_numbers<[1], [0], [0], [1], [0, 0, 1, 1], [], []>} : vector<2x32xf32>, vector<32x128xf32>, vector<2x128xf32> -> vector<2x128xf32>
    %254 = arith.addf %252, %253 : vector<2x128xf32>
    %255 = vector.broadcast %23 : vector<1x128xf32> to vector<2x128xf32>
    %256 = arith.addf %254, %255 : vector<2x128xf32>
    %257 = arith.mulf %256, %8 : vector<2x128xf32>
    %258 = math.tanh %257 : vector<2x128xf32>
    %259 = arith.mulf %258, %8 : vector<2x128xf32>
    %260 = arith.addf %259, %11 : vector<2x128xf32>
    %261 = vector.extract_strided_slice %260 {offsets = [0, 0], sizes = [2, 32], strides = [1, 1]} : vector<2x128xf32> to vector<2x32xf32>
    %262 = vector.extract_strided_slice %260 {offsets = [0, 32], sizes = [2, 32], strides = [1, 1]} : vector<2x128xf32> to vector<2x32xf32>
    %263 = vector.extract_strided_slice %260 {offsets = [0, 64], sizes = [2, 32], strides = [1, 1]} : vector<2x128xf32> to vector<2x32xf32>
    %264 = vector.extract_strided_slice %260 {offsets = [0, 96], sizes = [2, 32], strides = [1, 1]} : vector<2x128xf32> to vector<2x32xf32>
    %265 = arith.mulf %262, %232 : vector<2x32xf32>
    %266 = arith.mulf %261, %263 : vector<2x32xf32>
    %267 = arith.addf %265, %266 : vector<2x32xf32>
    %268 = math.tanh %267 : vector<2x32xf32>
    %269 = arith.mulf %264, %268 : vector<2x32xf32>
    %270 = vector.extract_strided_slice %19 {offsets = [0, 7, 0], sizes = [2, 1, 128], strides = [1, 1, 1]} : vector<2x8x128xf32> to vector<2x1x128xf32>
    %271 = vector.shape_cast %270 : vector<2x1x128xf32> to vector<2x128xf32>
    %cst_40 = arith.constant dense<0.000000e+00> : vector<2x128xf32>
    %272 = tpu.matmul %251, %20, %cst_40 {dimension_numbers = #tpu.dot_dimension_numbers<[1], [0], [0], [1], [0, 0, 1, 1], [], []>} : vector<2x32xf32>, vector<32x128xf32>, vector<2x128xf32> -> vector<2x128xf32>
    %273 = arith.addf %271, %272 : vector<2x128xf32>
    %274 = arith.mulf %273, %8 : vector<2x128xf32>
    %275 = math.tanh %274 : vector<2x128xf32>
    %276 = arith.mulf %275, %8 : vector<2x128xf32>
    %277 = arith.addf %276, %11 : vector<2x128xf32>
    %278 = vector.extract_strided_slice %277 {offsets = [0, 0], sizes = [2, 32], strides = [1, 1]} : vector<2x128xf32> to vector<2x32xf32>
    %279 = vector.extract_strided_slice %277 {offsets = [0, 32], sizes = [2, 32], strides = [1, 1]} : vector<2x128xf32> to vector<2x32xf32>
    %280 = vector.extract_strided_slice %277 {offsets = [0, 64], sizes = [2, 32], strides = [1, 1]} : vector<2x128xf32> to vector<2x32xf32>
    %281 = vector.extract_strided_slice %277 {offsets = [0, 96], sizes = [2, 32], strides = [1, 1]} : vector<2x128xf32> to vector<2x32xf32>
    %282 = arith.mulf %279, %249 : vector<2x32xf32>
    %283 = arith.mulf %278, %280 : vector<2x32xf32>
    %284 = arith.addf %282, %283 : vector<2x32xf32>
    %285 = math.tanh %284 : vector<2x32xf32>
    %286 = arith.mulf %281, %285 : vector<2x32xf32>
    %cst_41 = arith.constant dense<0.000000e+00> : vector<2x128xf32>
    %287 = tpu.matmul %286, %21, %cst_41 {dimension_numbers = #tpu.dot_dimension_numbers<[1], [0], [0], [1], [0, 0, 1, 1], [], []>} : vector<2x32xf32>, vector<32x128xf32>, vector<2x128xf32> -> vector<2x128xf32>
    %cst_42 = arith.constant dense<0.000000e+00> : vector<2x128xf32>
    %288 = tpu.matmul %269, %22, %cst_42 {dimension_numbers = #tpu.dot_dimension_numbers<[1], [0], [0], [1], [0, 0, 1, 1], [], []>} : vector<2x32xf32>, vector<32x128xf32>, vector<2x128xf32> -> vector<2x128xf32>
    %289 = arith.addf %287, %288 : vector<2x128xf32>
    %290 = vector.broadcast %23 : vector<1x128xf32> to vector<2x128xf32>
    %291 = arith.addf %289, %290 : vector<2x128xf32>
    %292 = arith.mulf %291, %8 : vector<2x128xf32>
    %293 = math.tanh %292 : vector<2x128xf32>
    %294 = arith.mulf %293, %8 : vector<2x128xf32>
    %295 = arith.addf %294, %11 : vector<2x128xf32>
    %296 = vector.extract_strided_slice %295 {offsets = [0, 0], sizes = [2, 32], strides = [1, 1]} : vector<2x128xf32> to vector<2x32xf32>
    %297 = vector.extract_strided_slice %295 {offsets = [0, 32], sizes = [2, 32], strides = [1, 1]} : vector<2x128xf32> to vector<2x32xf32>
    %298 = vector.extract_strided_slice %295 {offsets = [0, 64], sizes = [2, 32], strides = [1, 1]} : vector<2x128xf32> to vector<2x32xf32>
    %299 = vector.extract_strided_slice %295 {offsets = [0, 96], sizes = [2, 32], strides = [1, 1]} : vector<2x128xf32> to vector<2x32xf32>
    %300 = arith.mulf %297, %267 : vector<2x32xf32>
    %301 = arith.mulf %296, %298 : vector<2x32xf32>
    %302 = arith.addf %300, %301 : vector<2x32xf32>
    %303 = math.tanh %302 : vector<2x32xf32>
    %304 = arith.mulf %299, %303 : vector<2x32xf32>
    %c0_43 = arith.constant 0 : index
    %c0_44 = arith.constant 0 : index
    %305 = vector.load %arg7[%c0_43, %c0_44] : memref<32x10xf32, #tpu.memory_space<vmem>>, vector<32x10xf32>
    %cst_45 = arith.constant dense<0.000000e+00> : vector<2x10xf32>
    %306 = tpu.matmul %304, %305, %cst_45 {dimension_numbers = #tpu.dot_dimension_numbers<[1], [0], [0], [1], [0, 0, 1, 1], [], []>} : vector<2x32xf32>, vector<32x10xf32>, vector<2x10xf32> -> vector<2x10xf32>
    %c0_46 = arith.constant 0 : index
    %c0_47 = arith.constant 0 : index
    %307 = vector.load %arg8[%c0_46, %c0_47] : memref<1x10xf32, #tpu.memory_space<vmem>>, vector<1x10xf32>
    %308 = vector.broadcast %307 : vector<1x10xf32> to vector<2x10xf32>
    %309 = arith.addf %306, %308 : vector<2x10xf32>
    %c0_48 = arith.constant 0 : index
    %c0_49 = arith.constant 0 : index
    %310 = vector.load %arg9[%c0_48, %c0_49] : memref<2x10xf32, #tpu.memory_space<vmem>>, vector<2x10xf32>
    tpu.vector_store %arg9[%c0_48, %c0_49], %309 {strides = array<i32>} : memref<2x10xf32, #tpu.memory_space<vmem>>, vector<2x10xf32>,
    return
  }
}

</mosaic_0001>

<bundles_post_ra>
// kernel: lstm_net_forward.1
= control target key start
LH: loop header
LB: loop body
LE: loop exit
PB: predicated region body
PF: predicated region fallthrough
CT: control target
= control target key end

     0   :  { %14 = vsyncpa [#allocation3], 0  ;;  %s4144_s0 = inlined_call_operand.hbm [shape: f32[2,8,16], index: 0, kind: input, shape index: {}]   ;;  %s4145_s1 = inlined_call_operand.hbm [shape: f32[16,128], index: 1, kind: input, shape index: {}]   ;;  %s4146_s2 = inlined_call_operand.vmem [shape: f32[32,128], index: 2, kind: input, shape index: {}]   ;;  %s4147_s3 = inlined_call_operand.vmem [shape: f32[1,128], index: 3, kind: input, shape index: {}]   ;;  %s4148_s4 = inlined_call_operand.hbm [shape: f32[32,128], index: 4, kind: input, shape index: {}]   ;;  %s4149_s5 = inlined_call_operand.vmem [shape: f32[32,128], index: 5, kind: input, shape index: {}]   ;;  %s4150_s6 = inlined_call_operand.vmem [shape: f32[1,128], index: 6, kind: input, shape index: {}]   ;;  %s4151_s7 = inlined_call_operand.vmem [shape: f32[32,10], index: 7, kind: input, shape index: {}]   ;;  %s4152_s8 = inlined_call_operand.vmem [shape: f32[1,10], index: 8, kind: input, shape index: {}]   ;;  %s4153_s9 = inlined_call_operand.hbm [shape: f32[2,10], index: 9, kind: output, shape index: {}]  }
   0x1   :  { %15 = vsyncpa [#allocation6], 0 }
   0x2   :  { %16 = vsyncpa [#allocation4], 0  ;;  %s3491_s30 = smov [#allocation5]   ;;  %s3492_s11 = smov [#allocation2]  }
   0x3   :  { %s34_s10 = sshll.u32 %s3491_s30, 4  ;;  %s22_s12 = sshll.u32 %s3492_s11, 4  ;;  %s35_s10 = int_to_ptr.vmem [resolvable:$true] %s34_s10  ;;  %s3553_s12 = int_to_ptr.vmem [resolvable:$true] %s22_s12 }
   0x4   :  { %s3397_s15 = scalar_lea.hbm %s4145_s1, 256 }
   0x5   :  { %p3398_p0 = scmp.ne.s32.totalorder %s4145_s1, %s3397_s15  ;;  %p3401_p1 = scmp.lt.u32.totalorder %s3397_s15, %s4145_s1 }
   0x7   :  { %p3403_p2 = pnand %p3401_p1, %p3398_p0 }
   0x9   :  { %3406 = shalt.err (!%p3403_p2)
}
   0xa   :  { %s3407_s20 = scalar_lea.vmem %s35_s10, 256  ;;  %p3412_p4 = scmp.lt.s32.totalorder %s35_s10, %s35_s10 }
   0xb   :  { %p3408_p3 = scmp.ne.s32.totalorder %s35_s10, %s3407_s20  ;;  %p3413_p5 = scmp.lt.s32.totalorder %s3407_s20, %s3407_s20 }
   0xd   :  { %p3414_p6 = por %p3413_p5, %p3412_p4 }
   0xf   :  { %p3415_p7 = pnand %p3414_p6, %p3408_p3 }
  0x11   :  { %3418 = shalt.err (!%p3415_p7)
}
  0x12   :  { %s3493_s21 = smov 128   ;;  %s3494_s22 = smov 8  }
  0x13   :  { %40 = dma.hbm_to_vmem [thread:$0]  %s4145_s1, 256, %s35_s10, [#allocation6], %s3493_s21, %s3493_s21, %s3494_s22  }
  0x14   :  { %s3419_s27 = scalar_lea.hbm %s4144_s0, 256 }
  0x15   :  { %p3420_p8 = scmp.ne.s32.totalorder %s4144_s0, %s3419_s27  ;;  %p3423_p9 = scmp.lt.u32.totalorder %s3419_s27, %s4144_s0 }
  0x17   :  { %p3425_p10 = pnand %p3423_p9, %p3420_p8 }
  0x19   :  { %3428 = shalt.err (!%p3425_p10)
}
  0x1a   :  { %s3429_s13 = scalar_lea.vmem %s3553_s12, 256  ;;  %p3434_p12 = scmp.lt.s32.totalorder %s3553_s12, %s3553_s12 }
  0x1b   :  { %p3430_p11 = scmp.ne.s32.totalorder %s3553_s12, %s3429_s13  ;;  %p3435_p13 = scmp.lt.s32.totalorder %s3429_s13, %s3429_s13 }
  0x1d   :  { %p3436_p0 = por %p3435_p13, %p3434_p12 }
  0x1f   :  { %p3437_p1 = pnand %p3436_p0, %p3430_p11 }
  0x21   :  { %3440 = shalt.err (!%p3437_p1)
}
  0x22   :  { %28 = dma.hbm_to_vmem [thread:$0]  %s4144_s0, 256, %s3553_s12, [#allocation3], %s3493_s21, %s3493_s21, %s3494_s22  }
  0x23   :  { %s3495_s14 = smov [#allocation7]   ;;  %s3441_s18 = scalar_lea.hbm %s4148_s4, 512 }
  0x24   :  { %s50_s15 = sshll.u32 %s3495_s14, 4  ;;  %p3442_p2 = scmp.ne.s32.totalorder %s4148_s4, %s3441_s18  ;;  %s51_s15 = int_to_ptr.vmem [resolvable:$true] %s50_s15 }
  0x25   :  { %p3445_p3 = scmp.lt.u32.totalorder %s3441_s18, %s4148_s4 }
  0x27   :  { %p3447_p4 = pnand %p3445_p3, %p3442_p2 }
  0x29   :  { %3450 = shalt.err (!%p3447_p4)
}
  0x2a   :  { %s3451_s25 = scalar_lea.vmem %s51_s15, 512  ;;  %p3456_p6 = scmp.lt.s32.totalorder %s51_s15, %s51_s15 }
  0x2b   :  { %p3452_p5 = scmp.ne.s32.totalorder %s51_s15, %s3451_s25  ;;  %p3457_p7 = scmp.lt.s32.totalorder %s3451_s25, %s3451_s25 }
  0x2d   :  { %p3458_p8 = por %p3457_p7, %p3456_p6 }
  0x2f   :  { %p3459_p9 = pnand %p3458_p8, %p3452_p5 }
  0x31   :  { %3462 = shalt.err (!%p3459_p9)
}
  0x32   :  { %56 = dma.hbm_to_vmem [thread:$0]  %s4148_s4, 512, %s51_s15, [#allocation6], %s3493_s21, %s3493_s21, %s3494_s22  }
  0x33   :  { %3485 = dma.done.wait [#allocation3], 256  }
  0x34   :  { %3486 = vsyncadd [#allocation3], 4294967040 }
  0x35   :  { %3487 = dma.done.wait [#allocation6], 768  }
  0x36   :  { %3488 = vsyncadd [#allocation6], 4294966528  ;;  %v3496_v0 = vmov 0.0|0.0   ;;  %vm3497_vm0 = vmmov 0   ;;  %v3498_v1 = vmov 0.0   ;;  %vm92_vm1 = vcmask 130048  }
  0x37   :  { %3138 = vmatprep.subr.bf16.mxu1 %v3496_v0  ;;  %2867 = vmatprep.mubr.msk.f32.mxu1 %vm3497_vm0, %v3498_v1  ;;  %v83_v2 = vld [vmem:[#allocation5] sm:$0xff]  ;;  %v84_v3 = vld [vmem:[#allocation5 + $0x8] sm:$0xff]  ;;  %v174_v4 = vld [vmem:[%s4146_s2] sm:$0xff]  ;;  %v74_v13 = vlaneseq  ;;  %v3499_v21 = vmov 0.5   ;;  %s3501_s13 = smov 32   ;;  %vm382_vm5 = vcmask 1041409  }
  0x38   :  { %v3134_v5 = vpack.c.bf16 %v84_v3, %v83_v2  ;;  %v175_v6 = vld [vmem:[%s4146_s2 + $0x8] sm:$0xff]  ;;  %v81_v7 = vld [vmem:[#allocation2] sm:$0xff]  ;;  %v176_v9 = vld [vmem:[%s4146_s2 + $0x10] sm:$0xff]  ;;  %vm187_vm6 = vcmask 261120   ;;  %vm2677_vm7 = vcmask 74752  }
  0x39   :  { %v3614_v8 = vpack.c.bf16 %v175_v6, %v174_v4  ;;  %2856 = vmatprep.mubr.msk.f32.mxu0 %vm92_vm1, %v81_v7  ;;  %v177_v10 = vld [vmem:[%s4146_s2 + $0x18] sm:$0xff]  ;;  %v82_v11 = vld [vmem:[#allocation2 + $0x8] sm:$0xff]  ;;  %v75_v14 = vand.u32 127, %v74_v13  ;;  %v2695_v15 = vld [vmem:[%s4147_s3] ss:$0 sm:$0xff]  ;;  %s3500_s3 = smov 64  }
  0x3a   :  { %3135 = vmatprep.subr.bf16.mxu0 %v3134_v5  ;;  %v3624_v12 = vpack.c.bf16 %v177_v10, %v176_v9  ;;  %v182_v47 = vld [vmem:[%s4149_s5] sm:$0xff]  ;;  %v183_v48 = vld [vmem:[%s4149_s5 + $0x8] sm:$0xff]  ;;  %v184_v49 = vld [vmem:[%s4149_s5 + $0x10] sm:$0xff] }
  0x3b   :  { %3140 = vmatpush3.bf16.msra.mxu1 %v3614_v8  ;;  %3137 = vmatpush3.bf16.msra.mxu0 %v3134_v5  ;;  %vm76_vm2 = vcmp.ge.s32.totalorder %v75_v14, 64  ;;  %vm77_vm3 = vcmp.lt.s32.totalorder %v75_v14, 96  ;;  %v3682_v50 = vpack.c.bf16 %v183_v48, %v182_v47  ;;  %v185_v51 = vld [vmem:[%s4149_s5 + $0x18] sm:$0xff]  ;;  %v178_v52 = vld [vmem:[#allocation7] sm:$0xff]  ;;  %v179_v53 = vld [vmem:[#allocation7 + $0x8] sm:$0xff] }
  0x3c   :  { %3141 = vmatprep.subr.bf16.mxu1 %v3496_v0  ;;  %3144 = vmatprep.subr.bf16.mxu0 %v3496_v0  ;;  %vm3639_vm4 = vmand %vm76_vm2, %vm77_vm3  ;;  %v3687_v54 = vpack.c.bf16 %v179_v53, %v178_v52  ;;  %v180_v55 = vld [vmem:[#allocation7 + $0x10] sm:$0xff]  ;;  %v181_v56 = vld [vmem:[#allocation7 + $0x18] sm:$0xff]  ;;  %v3690_v57 = vpack.c.bf16 %v185_v51, %v184_v49 }
  0x3d   :  { %v3649_v22 = vsel %vm3639_vm4, 1.0, %v3499_v21  ;;  %v3658_v33 = vsel %vm3639_vm4, 0.0, %v3499_v21  ;;  %v3694_v58 = vpack.c.bf16 %v181_v56, %v180_v55  ;;  %v3729_v9 = vld [vmem:[%s4150_s6] ss:$0 sm:$0xff] }
  0x3e   :  { %2857 = vmatmul.mubr.msk.f32.vlgmr.msra.gmra.mrb[0].mxu0 %vm92_vm1, %v82_v11 }
  0x3f   :  { %3143 = vmatpush3.bf16.msra.mxu1 %v3624_v12  ;;  %2878 = vmatprep.mubr.msk.f32.mxu0 %vm3497_vm0, %v3498_v1 }
  0x40   :  { %3150 = vmatprep.subr.bf16.mxu1 %v3496_v0  ;;  %3146 = vmatpush3.bf16.msra.mxu0 %v3682_v50 }
  0x41   :  { %3147 = vmatprep.subr.bf16.mxu0 %v3496_v0 }
  0x42   :  { %2868 = vmatmul.mubr.f32.vlgmr.msra.gmra.mrb[0].mxu1 %v3498_v1 }
  0x43   :  { %2889 = vmatprep.mubr.msk.f32.mxu1 %vm3497_vm0, %v3498_v1  ;;  %3152 = vmatpush3.bf16.msra.mxu1 %v3687_v54 }
  0x44   :  { %3153 = vmatprep.subr.bf16.mxu1 %v3496_v0  ;;  %3149 = vmatpush3.bf16.msra.mxu0 %v3690_v57 }
  0x45   :  { %3156 = vmatprep.subr.bf16.mxu0 %v3496_v0 }
  0x47   :  { %3155 = vmatpush3.bf16.msra.mxu1 %v3694_v58  ;;  %2879 = vmatmul.mubr.f32.vlgmr.msra.gmra.mrb[2].mxu0 %v3498_v1 }
  0x48   :  { %3162 = vmatprep.subr.bf16.mxu1 %v3496_v0  ;;  %3158 = vmatpush3.bf16.msra.mxu0 %v3614_v8 }
  0x49   :  { %2900 = vmatprep.mubr.msk.f32.mxu0 %vm3497_vm0, %v3498_v1  ;;  %3159 = vmatprep.subr.bf16.mxu0 %v3496_v0 }
  0x4c   :  { %3161 = vmatpush3.bf16.msra.mxu0 %v3624_v12 }
  0x4d   :  { %3168 = vmatprep.subr.bf16.mxu0 %v3496_v0 }
 0x111   :  { %v2858_v16 = vpop.f32.mrb[0].mxu0 }
 0x112   :  { %v165_v17 = vpop.f32.mrb[1].mxu0  ;;  %v3645_v20 = vadd.f32 %v2858_v16, %v2695_v15 }
 0x113   :  { %v3643_v19 = vadd.f32 %v2695_v15, %v165_v17 }
 0x115   :  { %v257_v23 = vpop.f32.mrb[0].mxu1 }
 0x116   :  { %v262_v24 = vrot.slane %v257_v23, 1  ;;  %v265_v25 = vadd.f32 %v257_v23, %v3643_v19  ;;  %v2869_v26 = vpop.f32.mrb[1].mxu1 }
 0x118   :  { %v266_v27 = vadd.f32 %v262_v24, %v3645_v20  ;;  %v267_v28 = vmul.f32 %v265_v25, %v3649_v22 }
 0x11a   :  { %v268_v29 = vmul.f32 %v266_v27, %v3649_v22  ;;  %3300 = vtanh.f32 %v267_v28  ;;  %v375_v5 = vpop.f32.mrb[2].mxu0 }
 0x11b   :  { %v2880_v6 = vpop.f32.mrb[3].mxu0 }
 0x11c   :  { %3302 = vtanh.f32 %v268_v29 }
 0x124   :  { %v3301_v30 = vpop.eup %3300 }
 0x125   :  { %v271_v35 = vmul.f32 %v3301_v30, %v3649_v22 }
 0x126   :  { %v3303_v31 = vpop.eup %3302 }
 0x127   :  { %v272_v32 = vmul.f32 %v3303_v31, %v3649_v22  ;;  %v273_v36 = vadd.f32 %v271_v35, %v3658_v33 }
 0x129   :  { %v274_v34 = vadd.f32 %v272_v32, %v3658_v33  ;;  %v275_v44 = vmul.f32 0.0, %v273_v36 }
 0x12b   :  { %281 = vrot.lane.b32.xlu0 %v274_v34, %s3500_s3  ;;  %v276_v41 = vmul.f32 0.0, %v274_v34 }
 0x12f   :  { %279 = vrot.lane.b32.xlu0 %v273_v36, %s3500_s3 }
 0x19d   :  { %v282_v37 = vpop.permute.xlu0 %281 }
 0x19e   :  { %v286_v38 = vmul.f32 %v282_v37, %v274_v34 }
 0x1a0   :  { %291 = vrot.lane.b32.xlu1 %v286_v38, %s3501_s13 }
 0x1a1   :  { %v280_v39 = vpop.permute.xlu0 %279 }
 0x1a2   :  { %v285_v40 = vmul.f32 %v280_v39, %v273_v36 }
 0x1a4   :  { %289 = vrot.lane.b32.xlu1 %v285_v40, %s3501_s13 }
 0x212   :  { %v292_v42 = vpop.permute.xlu1 %291 }
 0x213   :  { %v3667_v43 = vadd.f32 %v292_v42, %v276_v41 }
 0x215   :  { %3304 = vtanh.f32 %v3667_v43  ;;  %v573_v48 = vrot.slane %v3667_v43, 7 }
 0x216   :  { %v290_v45 = vpop.permute.xlu1 %289 }
 0x217   :  { %v3670_v46 = vadd.f32 %v290_v45, %v275_v44 }
 0x219   :  { %3306 = vtanh.f32 %v3670_v46  ;;  %v572_v42 = vrot.slane %v3670_v46, 7 }
 0x21f   :  { %v3305_v59 = vpop.eup %3304 }
 0x220   :  { %303 = vrot.lane.b32.xlu0 %v3305_v59, %s3500_s3 }
 0x223   :  { %v3307_v60 = vpop.eup %3306 }
 0x224   :  { %301 = vrot.lane.b32.xlu1 %v3307_v60, %s3500_s3 }
 0x292   :  { %v304_v61 = vpop.permute.xlu0 %303 }
 0x293   :  { %v308_v62 = vmul.f32 %v304_v61, %v274_v34 }
 0x295   :  { %v381_v2 = vrot.slane %v308_v62, 7 }
 0x296   :  { %v302_v63 = vpop.permute.xlu1 %301 }
 0x297   :  { %v307_v3 = vmul.f32 %v302_v63, %v273_v36 }
 0x299   :  { %v383_v4 = vsel %vm382_vm5, %v381_v2, %v307_v3 }
 0x29a   :  { %384 = vrot.lane.b32.xlu0 %v383_v4, %s3501_s13 }
 0x30c   :  { %v385_v7 = vpop.permute.xlu0 %384 }
 0x30d   :  { %2890 = vmatmul.mubr.msk.f32.vlgmr.msra.gmra.mrb[2].mxu1 %vm187_vm6, %v385_v7  ;;  %2901 = vmatmul.mubr.msk.f32.vlgmr.msra.gmra.mrb[4].mxu0 %vm187_vm6, %v385_v7 }
 0x30e   :  { %3164 = vmatpush3.bf16.msra.mxu1 %v3682_v50  ;;  %3170 = vmatpush3.bf16.msra.mxu0 %v3687_v54 }
 0x30f   :  { %3165 = vmatprep.subr.bf16.mxu1 %v3496_v0  ;;  %2911 = vmatprep.mubr.msk.f32.mxu1 %vm3497_vm0, %v3498_v1 }
 0x310   :  { %3171 = vmatprep.subr.bf16.mxu0 %v3496_v0  ;;  %2922 = vmatprep.mubr.msk.f32.mxu0 %vm3497_vm0, %v3498_v1 }
 0x312   :  { %3167 = vmatpush3.bf16.msra.mxu1 %v3690_v57  ;;  %3173 = vmatpush3.bf16.msra.mxu0 %v3694_v58 }
 0x313   :  { %3174 = vmatprep.subr.bf16.mxu1 %v3496_v0  ;;  %3180 = vmatprep.subr.bf16.mxu0 %v3496_v0 }
 0x3e0   :  { %v454_v10 = vpop.f32.mrb[2].mxu1  ;;  %v552_v11 = vpop.f32.mrb[4].mxu0 }
 0x3e1   :  { %v455_v13 = vadd.f32 %v454_v10, %v375_v5  ;;  %v557_v14 = vrot.slane %v552_v11, 7  ;;  %v561_v15 = vadd.f32 %v552_v11, %v3645_v20  ;;  %v2891_v16 = vpop.f32.mrb[3].mxu1  ;;  %v2902_v17 = vpop.f32.mrb[5].mxu0 }
 0x3e3   :  { %v464_v18 = vadd.f32 %v3729_v9, %v455_v13  ;;  %v560_v21 = vadd.f32 %v557_v14, %v3643_v19  ;;  %v563_v23 = vmul.f32 %v561_v15, %v3649_v22 }
 0x3e5   :  { %v465_v24 = vmul.f32 %v464_v18, %v3649_v22  ;;  %v562_v25 = vmul.f32 %v560_v21, %v3649_v22  ;;  %3308 = vtanh.f32 %v563_v23 }
 0x3e7   :  { %3310 = vtanh.f32 %v465_v24 }
 0x3e8   :  { %3312 = vtanh.f32 %v562_v25 }
 0x3ef   :  { %v3309_v26 = vpop.eup %3308 }
 0x3f0   :  { %v567_v32 = vmul.f32 %v3309_v26, %v3649_v22 }
 0x3f1   :  { %v3311_v27 = vpop.eup %3310 }
 0x3f2   :  { %v3313_v28 = vpop.eup %3312  ;;  %v467_v29 = vmul.f32 %v3311_v27, %v3649_v22  ;;  %v569_v35 = vadd.f32 %v567_v32, %v3658_v33 }
 0x3f3   :  { %v566_v30 = vmul.f32 %v3313_v28, %v3649_v22 }
 0x3f4   :  { %v468_v31 = vadd.f32 %v467_v29, %v3658_v33  ;;  %v577_v53 = vmul.f32 %v573_v48, %v569_v35 }
 0x3f5   :  { %v568_v34 = vadd.f32 %v566_v30, %v3658_v33 }
 0x3f6   :  { %471 = vrot.lane.b32.xlu1 %v468_v31, %s3500_s3  ;;  %v469_v44 = vmul.f32 0.0, %v468_v31 }
 0x3f7   :  { %580 = vrot.lane.b32.xlu0 %v568_v34, %s3500_s3  ;;  %v576_v47 = vmul.f32 %v572_v42, %v568_v34 }
 0x3fa   :  { %582 = vrot.lane.b32.xlu1 %v569_v35, %s3500_s3 }
 0x468   :  { %v472_v36 = vpop.permute.xlu1 %471 }
 0x469   :  { %v581_v37 = vpop.permute.xlu0 %580  ;;  %v474_v38 = vmul.f32 %v472_v36, %v468_v31 }
 0x46a   :  { %v586_v39 = vmul.f32 %v581_v37, %v568_v34 }
 0x46b   :  { %476 = vrot.lane.b32.xlu0 %v474_v38, %s3501_s13 }
 0x46c   :  { %590 = vrot.lane.b32.xlu1 %v586_v39, %s3501_s13  ;;  %v583_v40 = vpop.permute.xlu1 %582 }
 0x46d   :  { %v587_v41 = vmul.f32 %v583_v40, %v569_v35 }
 0x46f   :  { %592 = vrot.lane.b32.xlu0 %v587_v41, %s3501_s13 }
 0x4dd   :  { %v477_v45 = vpop.permute.xlu0 %476 }
 0x4de   :  { %v3751_v49 = vadd.f32 %v477_v45, %v469_v44  ;;  %v591_v51 = vpop.permute.xlu1 %590 }
 0x4df   :  { %v3753_v52 = vadd.f32 %v591_v51, %v576_v47 }
 0x4e0   :  { %3314 = vtanh.f32 %v3751_v49 }
 0x4e1   :  { %3316 = vtanh.f32 %v3753_v52  ;;  %v593_v55 = vpop.permute.xlu0 %592  ;;  %v872_v48 = vrot.slane %v3753_v52, 7 }
 0x4e2   :  { %v3757_v56 = vadd.f32 %v593_v55, %v577_v53 }
 0x4e4   :  { %3318 = vtanh.f32 %v3757_v56  ;;  %v873_v53 = vrot.slane %v3757_v56, 7 }
 0x4ea   :  { %v3315_v46 = vpop.eup %3314 }
 0x4eb   :  { %v3317_v59 = vpop.eup %3316  ;;  %482 = vrot.lane.b32.xlu1 %v3315_v46, %s3500_s3 }
 0x4ec   :  { %602 = vrot.lane.b32.xlu0 %v3317_v59, %s3500_s3 }
 0x4ee   :  { %v3319_v43 = vpop.eup %3318 }
 0x4ef   :  { %604 = vrot.lane.b32.xlu1 %v3319_v43, %s3500_s3 }
 0x55d   :  { %v483_v60 = vpop.permute.xlu1 %482 }
 0x55e   :  { %v603_v61 = vpop.permute.xlu0 %602  ;;  %v485_v62 = vmul.f32 %v483_v60, %v468_v31 }
 0x55f   :  { %v608_v63 = vmul.f32 %v603_v61, %v568_v34 }
 0x560   :  { %611 = vrot.lane.b32.xlu0 %v485_v62, %s3501_s13 }
 0x561   :  { %v605_v2 = vpop.permute.xlu1 %604  ;;  %v687_v3 = vrot.slane %v608_v63, 1 }
 0x562   :  { %v609_v4 = vmul.f32 %v605_v2, %v569_v35 }
 0x564   :  { %v688_v5 = vsel %vm382_vm5, %v609_v4, %v687_v3 }
 0x565   :  { %689 = vrot.lane.b32.xlu1 %v688_v5, %s3501_s13 }
 0x5d2   :  { %v612_v6 = vpop.permute.xlu0 %611 }
 0x5d3   :  { %2912 = vmatmul.mubr.msk.f32.vlgmr.msra.gmra.mrb[4].mxu1 %vm187_vm6, %v612_v6 }
 0x5d4   :  { %3176 = vmatpush3.bf16.msra.mxu1 %v3614_v8  ;;  %2933 = vmatprep.mubr.msk.f32.mxu1 %vm3497_vm0, %v3498_v1 }
 0x5d5   :  { %3177 = vmatprep.subr.bf16.mxu1 %v3496_v0 }
 0x5d7   :  { %v690_v7 = vpop.permute.xlu1 %689 }
 0x5d8   :  { %3179 = vmatpush3.bf16.msra.mxu1 %v3624_v12  ;;  %2923 = vmatmul.mubr.msk.f32.vlgmr.msra.gmra.mrb[6].mxu0 %vm187_vm6, %v690_v7 }
 0x5d9   :  { %3182 = vmatpush3.bf16.msra.mxu0 %v3682_v50  ;;  %2944 = vmatprep.mubr.msk.f32.mxu0 %vm3497_vm0, %v3498_v1 }
 0x5da   :  { %3183 = vmatprep.subr.bf16.mxu0 %v3496_v0  ;;  %3186 = vmatprep.subr.bf16.mxu1 %v3496_v0 }
 0x5db   :  { %2934 = vmatmul.mubr.msk.f32.vlgmr.msra.gmra.mrb[6].mxu1 %vm187_vm6, %v690_v7 }
 0x5dc   :  { %3188 = vmatpush3.bf16.msra.mxu1 %v3687_v54  ;;  %2955 = vmatprep.mubr.msk.f32.mxu1 %vm3497_vm0, %v3498_v1 }
 0x5dd   :  { %3185 = vmatpush3.bf16.msra.mxu0 %v3690_v57  ;;  %3189 = vmatprep.subr.bf16.mxu1 %v3496_v0 }
 0x5de   :  { %3192 = vmatprep.subr.bf16.mxu0 %v3496_v0 }
 0x5e0   :  { %3191 = vmatpush3.bf16.msra.mxu1 %v3694_v58 }
 0x5e1   :  { %3198 = vmatprep.subr.bf16.mxu1 %v3496_v0 }
 0x6a6   :  { %v681_v10 = vpop.f32.mrb[4].mxu1 }
 0x6a7   :  { %v2913_v11 = vpop.f32.mrb[5].mxu1 }
 0x6ab   :  { %v759_v13 = vpop.f32.mrb[6].mxu0 }
 0x6ac   :  { %v760_v14 = vadd.f32 %v759_v13, %v681_v10  ;;  %v2924_v15 = vpop.f32.mrb[7].mxu0 }
 0x6ae   :  { %v763_v16 = vadd.f32 %v3729_v9, %v760_v14  ;;  %v851_v17 = vpop.f32.mrb[6].mxu1 }
 0x6af   :  { %v856_v18 = vrot.slane %v851_v17, 6  ;;  %v857_v21 = vrot.slane %v851_v17, 7  ;;  %v2935_v23 = vpop.f32.mrb[7].mxu1 }
 0x6b0   :  { %v764_v24 = vmul.f32 %v763_v16, %v3649_v22 }
 0x6b1   :  { %v860_v25 = vadd.f32 %v856_v18, %v3643_v19  ;;  %v861_v26 = vadd.f32 %v857_v21, %v3645_v20 }
 0x6b2   :  { %3320 = vtanh.f32 %v764_v24 }
 0x6b3   :  { %v862_v27 = vmul.f32 %v860_v25, %v3649_v22  ;;  %v863_v28 = vmul.f32 %v861_v26, %v3649_v22 }
 0x6b5   :  { %3322 = vtanh.f32 %v862_v27 }
 0x6b6   :  { %3324 = vtanh.f32 %v863_v28 }
 0x6bc   :  { %v3321_v29 = vpop.eup %3320 }
 0x6bd   :  { %v766_v30 = vmul.f32 %v3321_v29, %v3649_v22 }
 0x6bf   :  { %v3323_v31 = vpop.eup %3322  ;;  %v767_v32 = vadd.f32 %v766_v30, %v3658_v33 }
 0x6c0   :  { %v3325_v34 = vpop.eup %3324  ;;  %v866_v35 = vmul.f32 %v3323_v31, %v3649_v22 }
 0x6c1   :  { %770 = vrot.lane.b32.xlu0 %v767_v32, %s3500_s3  ;;  %v867_v36 = vmul.f32 %v3325_v34, %v3649_v22  ;;  %v768_v47 = vmul.f32 %v767_v32, %v3751_v49 }
 0x6c2   :  { %v868_v37 = vadd.f32 %v866_v35, %v3658_v33 }
 0x6c3   :  { %v869_v38 = vadd.f32 %v867_v36, %v3658_v33 }
 0x6c4   :  { %880 = vrot.lane.b32.xlu1 %v868_v37, %s3500_s3  ;;  %v876_v46 = vmul.f32 %v872_v48, %v868_v37 }
 0x6c5   :  { %882 = vrot.lane.b32.xlu0 %v869_v38, %s3500_s3  ;;  %v877_v43 = vmul.f32 %v873_v53, %v869_v38 }
 0x733   :  { %v771_v39 = vpop.permute.xlu0 %770 }
 0x734   :  { %v773_v40 = vmul.f32 %v771_v39, %v767_v32 }
 0x736   :  { %v881_v41 = vpop.permute.xlu1 %880  ;;  %775 = vrot.lane.b32.xlu1 %v773_v40, %s3501_s13 }
 0x737   :  { %v886_v42 = vmul.f32 %v881_v41, %v868_v37  ;;  %v883_v44 = vpop.permute.xlu0 %882 }
 0x738   :  { %v887_v45 = vmul.f32 %v883_v44, %v869_v38 }
 0x739   :  { %890 = vrot.lane.b32.xlu0 %v886_v42, %s3501_s13 }
 0x73a   :  { %892 = vrot.lane.b32.xlu1 %v887_v45, %s3501_s13 }
 0x7a8   :  { %v776_v51 = vpop.permute.xlu1 %775 }
 0x7a9   :  { %v3808_v55 = vadd.f32 %v776_v51, %v768_v47 }
 0x7ab   :  { %3326 = vtanh.f32 %v3808_v55  ;;  %v891_v59 = vpop.permute.xlu0 %890 }
 0x7ac   :  { %v3811_v60 = vadd.f32 %v891_v59, %v876_v46  ;;  %v893_v61 = vpop.permute.xlu1 %892 }
 0x7ad   :  { %v3813_v62 = vadd.f32 %v893_v61, %v877_v43 }
 0x7ae   :  { %3328 = vtanh.f32 %v3811_v60  ;;  %v1173_v46 = vrot.slane %v3811_v60, 7 }
 0x7af   :  { %3330 = vtanh.f32 %v3813_v62 }
 0x7b5   :  { %v3327_v49 = vpop.eup %3326 }
 0x7b6   :  { %781 = vrot.lane.b32.xlu0 %v3327_v49, %s3500_s3  ;;  %v1174_v49 = vrot.slane %v3813_v62, 7 }
 0x7b8   :  { %v3329_v52 = vpop.eup %3328 }
 0x7b9   :  { %v3331_v56 = vpop.eup %3330  ;;  %902 = vrot.lane.b32.xlu1 %v3329_v52, %s3500_s3 }
 0x7ba   :  { %904 = vrot.lane.b32.xlu0 %v3331_v56, %s3500_s3 }
 0x828   :  { %v782_v63 = vpop.permute.xlu0 %781 }
 0x829   :  { %v784_v2 = vmul.f32 %v782_v63, %v767_v32 }
 0x82b   :  { %v903_v3 = vpop.permute.xlu1 %902  ;;  %911 = vrot.lane.b32.xlu1 %v784_v2, %s3501_s13 }
 0x82c   :  { %v908_v4 = vmul.f32 %v903_v3, %v868_v37  ;;  %v905_v5 = vpop.permute.xlu0 %904 }
 0x82d   :  { %v909_v6 = vmul.f32 %v905_v5, %v869_v38 }
 0x82e   :  { %v987_v7 = vrot.slane %v908_v4, 2 }
 0x82f   :  { %v988_v10 = vrot.slane %v909_v6, 1 }
 0x831   :  { %v989_v11 = vsel %vm382_vm5, %v988_v10, %v987_v7 }
 0x832   :  { %990 = vrot.lane.b32.xlu0 %v989_v11, %s3501_s13 }
 0x89d   :  { %v912_v13 = vpop.permute.xlu1 %911 }
 0x89e   :  { %2945 = vmatmul.mubr.msk.f32.vlgmr.msra.gmra.mrb[8].mxu0 %vm187_vm6, %v912_v13 }
 0x89f   :  { %3194 = vmatpush3.bf16.msra.mxu0 %v3614_v8  ;;  %2966 = vmatprep.mubr.msk.f32.mxu0 %vm3497_vm0, %v3498_v1 }
 0x8a0   :  { %3195 = vmatprep.subr.bf16.mxu0 %v3496_v0 }
 0x8a3   :  { %3197 = vmatpush3.bf16.msra.mxu0 %v3624_v12 }
 0x8a4   :  { %v991_v14 = vpop.permute.xlu0 %990  ;;  %3204 = vmatprep.subr.bf16.mxu0 %v3496_v0 }
 0x8a5   :  { %2956 = vmatmul.mubr.msk.f32.vlgmr.msra.gmra.mrb[8].mxu1 %vm187_vm6, %v991_v14 }
 0x8a6   :  { %2967 = vmatmul.mubr.msk.f32.vlgmr.msra.gmra.mrb[10].mxu0 %vm187_vm6, %v991_v14  ;;  %3200 = vmatpush3.bf16.msra.mxu1 %v3682_v50 }
 0x8a7   :  { %3201 = vmatprep.subr.bf16.mxu1 %v3496_v0  ;;  %2977 = vmatprep.mubr.msk.f32.mxu1 %vm3497_vm0, %v3498_v1 }
 0x8a8   :  { %3206 = vmatpush3.bf16.msra.mxu0 %v3687_v54  ;;  %2988 = vmatprep.mubr.msk.f32.mxu0 %vm3497_vm0, %v3498_v1 }
 0x8a9   :  { %3207 = vmatprep.subr.bf16.mxu0 %v3496_v0 }
 0x8aa   :  { %3203 = vmatpush3.bf16.msra.mxu1 %v3690_v57 }
 0x8ab   :  { %3210 = vmatprep.subr.bf16.mxu1 %v3496_v0 }
 0x8ac   :  { %3209 = vmatpush3.bf16.msra.mxu0 %v3694_v58 }
 0x8ad   :  { %3216 = vmatprep.subr.bf16.mxu0 %v3496_v0 }
 0x971   :  { %v981_v15 = vpop.f32.mrb[8].mxu0 }
 0x972   :  { %v2946_v16 = vpop.f32.mrb[9].mxu0 }
 0x978   :  { %v1060_v17 = vpop.f32.mrb[8].mxu1 }
 0x979   :  { %v1061_v18 = vadd.f32 %v1060_v17, %v981_v15  ;;  %v1152_v21 = vpop.f32.mrb[10].mxu0  ;;  %v2957_v23 = vpop.f32.mrb[9].mxu1 }
 0x97a   :  { %v1157_v24 = vrot.slane %v1152_v21, 5  ;;  %v1158_v25 = vrot.slane %v1152_v21, 6  ;;  %v2968_v26 = vpop.f32.mrb[11].mxu0 }
 0x97b   :  { %v1064_v27 = vadd.f32 %v3729_v9, %v1061_v18 }
 0x97c   :  { %v1161_v28 = vadd.f32 %v1157_v24, %v3643_v19  ;;  %v1162_v29 = vadd.f32 %v1158_v25, %v3645_v20 }
 0x97d   :  { %v1065_v30 = vmul.f32 %v1064_v27, %v3649_v22 }
 0x97e   :  { %v1163_v31 = vmul.f32 %v1161_v28, %v3649_v22  ;;  %v1164_v32 = vmul.f32 %v1162_v29, %v3649_v22 }
 0x97f   :  { %3332 = vtanh.f32 %v1065_v30 }
 0x980   :  { %3334 = vtanh.f32 %v1163_v31 }
 0x981   :  { %3336 = vtanh.f32 %v1164_v32 }
 0x989   :  { %v3333_v34 = vpop.eup %3332 }
 0x98a   :  { %v3335_v35 = vpop.eup %3334  ;;  %v1067_v36 = vmul.f32 %v3333_v34, %v3649_v22 }
 0x98b   :  { %v3337_v37 = vpop.eup %3336  ;;  %v1167_v38 = vmul.f32 %v3335_v35, %v3649_v22 }
 0x98c   :  { %v1068_v39 = vadd.f32 %v1067_v36, %v3658_v33  ;;  %v1168_v40 = vmul.f32 %v3337_v37, %v3649_v22 }
 0x98d   :  { %v1169_v41 = vadd.f32 %v1167_v38, %v3658_v33 }
 0x98e   :  { %1071 = vrot.lane.b32.xlu1 %v1068_v39, %s3500_s3  ;;  %v1170_v42 = vadd.f32 %v1168_v40, %v3658_v33  ;;  %v1069_v59 = vmul.f32 %v1068_v39, %v3808_v55 }
 0x98f   :  { %1181 = vrot.lane.b32.xlu0 %v1169_v41, %s3500_s3  ;;  %v1177_v61 = vmul.f32 %v1173_v46, %v1169_v41 }
 0x990   :  { %v1178_v2 = vmul.f32 %v1174_v49, %v1170_v42 }
 0x992   :  { %1183 = vrot.lane.b32.xlu1 %v1170_v42, %s3500_s3 }
 0xa00   :  { %v1072_v44 = vpop.permute.xlu1 %1071 }
 0xa01   :  { %v1182_v45 = vpop.permute.xlu0 %1181  ;;  %v1074_v47 = vmul.f32 %v1072_v44, %v1068_v39 }
 0xa02   :  { %v1187_v48 = vmul.f32 %v1182_v45, %v1169_v41 }
 0xa03   :  { %1076 = vrot.lane.b32.xlu0 %v1074_v47, %s3501_s13 }
 0xa04   :  { %1191 = vrot.lane.b32.xlu1 %v1187_v48, %s3501_s13  ;;  %v1184_v51 = vpop.permute.xlu1 %1183 }
 0xa05   :  { %v1188_v53 = vmul.f32 %v1184_v51, %v1170_v42 }
 0xa07   :  { %1193 = vrot.lane.b32.xlu0 %v1188_v53, %s3501_s13 }
 0xa75   :  { %v1077_v43 = vpop.permute.xlu0 %1076 }
 0xa76   :  { %v3865_v52 = vadd.f32 %v1077_v43, %v1069_v59  ;;  %v1192_v56 = vpop.permute.xlu1 %1191 }
 0xa77   :  { %v3867_v63 = vadd.f32 %v1192_v56, %v1177_v61 }
 0xa78   :  { %3338 = vtanh.f32 %v3865_v52 }
 0xa79   :  { %3340 = vtanh.f32 %v3867_v63  ;;  %v1194_v3 = vpop.permute.xlu0 %1193  ;;  %v1474_v49 = vrot.slane %v3867_v63, 7 }
 0xa7a   :  { %v3871_v4 = vadd.f32 %v1194_v3, %v1178_v2 }
 0xa7c   :  { %3342 = vtanh.f32 %v3871_v4 }
 0xa82   :  { %v3339_v55 = vpop.eup %3338 }
 0xa83   :  { %v3341_v60 = vpop.eup %3340  ;;  %1082 = vrot.lane.b32.xlu1 %v3339_v55, %s3500_s3  ;;  %v1475_v55 = vrot.slane %v3871_v4, 7 }
 0xa84   :  { %1203 = vrot.lane.b32.xlu0 %v3341_v60, %s3500_s3 }
 0xa86   :  { %v3343_v62 = vpop.eup %3342 }
 0xa87   :  { %1205 = vrot.lane.b32.xlu1 %v3343_v62, %s3500_s3 }
 0xaf5   :  { %v1083_v5 = vpop.permute.xlu1 %1082 }
 0xaf6   :  { %v1204_v6 = vpop.permute.xlu0 %1203  ;;  %v1085_v7 = vmul.f32 %v1083_v5, %v1068_v39 }
 0xaf7   :  { %v1209_v10 = vmul.f32 %v1204_v6, %v1169_v41 }
 0xaf8   :  { %1212 = vrot.lane.b32.xlu0 %v1085_v7, %s3501_s13 }
 0xaf9   :  { %v1206_v11 = vpop.permute.xlu1 %1205  ;;  %v1288_v14 = vrot.slane %v1209_v10, 3 }
 0xafa   :  { %v1210_v13 = vmul.f32 %v1206_v11, %v1170_v42 }
 0xafc   :  { %v1289_v15 = vrot.slane %v1210_v13, 2 }
 0xafe   :  { %v1290_v16 = vsel %vm382_vm5, %v1289_v15, %v1288_v14 }
 0xaff   :  { %1291 = vrot.lane.b32.xlu1 %v1290_v16, %s3501_s13 }
 0xb6a   :  { %v1213_v17 = vpop.permute.xlu0 %1212 }
 0xb6b   :  { %2978 = vmatmul.mubr.msk.f32.vlgmr.msra.gmra.mrb[10].mxu1 %vm187_vm6, %v1213_v17 }
 0xb6c   :  { %3212 = vmatpush3.bf16.msra.mxu1 %v3614_v8  ;;  %2999 = vmatprep.mubr.msk.f32.mxu1 %vm3497_vm0, %v3498_v1 }
 0xb6d   :  { %3213 = vmatprep.subr.bf16.mxu1 %v3496_v0 }
 0xb70   :  { %3215 = vmatpush3.bf16.msra.mxu1 %v3624_v12 }
 0xb71   :  { %v1292_v18 = vpop.permute.xlu1 %1291  ;;  %3222 = vmatprep.subr.bf16.mxu1 %v3496_v0 }
 0xb72   :  { %2989 = vmatmul.mubr.msk.f32.vlgmr.msra.gmra.mrb[12].mxu0 %vm187_vm6, %v1292_v18 }
 0xb73   :  { %3000 = vmatmul.mubr.msk.f32.vlgmr.msra.gmra.mrb[12].mxu1 %vm187_vm6, %v1292_v18  ;;  %3218 = vmatpush3.bf16.msra.mxu0 %v3682_v50 }
 0xb74   :  { %3219 = vmatprep.subr.bf16.mxu0 %v3496_v0  ;;  %3010 = vmatprep.mubr.msk.f32.mxu0 %vm3497_vm0, %v3498_v1 }
 0xb75   :  { %3224 = vmatpush3.bf16.msra.mxu1 %v3687_v54  ;;  %3021 = vmatprep.mubr.msk.f32.mxu1 %vm3497_vm0, %v3498_v1 }
 0xb76   :  { %3225 = vmatprep.subr.bf16.mxu1 %v3496_v0 }
 0xb77   :  { %3221 = vmatpush3.bf16.msra.mxu0 %v3690_v57 }
 0xb78   :  { %3228 = vmatprep.subr.bf16.mxu0 %v3496_v0 }
 0xb79   :  { %3227 = vmatpush3.bf16.msra.mxu1 %v3694_v58 }
 0xb7a   :  { %3234 = vmatprep.subr.bf16.mxu1 %v3496_v0 }
 0xc3e   :  { %v1282_v21 = vpop.f32.mrb[10].mxu1 }
 0xc3f   :  { %v2979_v23 = vpop.f32.mrb[11].mxu1 }
 0xc45   :  { %v1361_v24 = vpop.f32.mrb[12].mxu0 }
 0xc46   :  { %v1362_v25 = vadd.f32 %v1361_v24, %v1282_v21  ;;  %v1453_v26 = vpop.f32.mrb[12].mxu1  ;;  %v2990_v27 = vpop.f32.mrb[13].mxu0 }
 0xc47   :  { %v1458_v28 = vrot.slane %v1453_v26, 4  ;;  %v1459_v29 = vrot.slane %v1453_v26, 5  ;;  %v3001_v30 = vpop.f32.mrb[13].mxu1 }
 0xc48   :  { %v1365_v31 = vadd.f32 %v3729_v9, %v1362_v25 }
 0xc49   :  { %v1462_v32 = vadd.f32 %v1458_v28, %v3643_v19  ;;  %v1463_v34 = vadd.f32 %v1459_v29, %v3645_v20 }
 0xc4a   :  { %v1366_v35 = vmul.f32 %v1365_v31, %v3649_v22 }
 0xc4b   :  { %v1464_v36 = vmul.f32 %v1462_v32, %v3649_v22  ;;  %v1465_v37 = vmul.f32 %v1463_v34, %v3649_v22 }
 0xc4c   :  { %3344 = vtanh.f32 %v1366_v35 }
 0xc4d   :  { %3346 = vtanh.f32 %v1464_v36 }
 0xc4e   :  { %3348 = vtanh.f32 %v1465_v37 }
 0xc56   :  { %v3345_v38 = vpop.eup %3344 }
 0xc57   :  { %v3347_v39 = vpop.eup %3346  ;;  %v1368_v40 = vmul.f32 %v3345_v38, %v3649_v22 }
 0xc58   :  { %v3349_v41 = vpop.eup %3348  ;;  %v1468_v42 = vmul.f32 %v3347_v39, %v3649_v22 }
 0xc59   :  { %v1369_v44 = vadd.f32 %v1368_v40, %v3658_v33  ;;  %v1469_v45 = vmul.f32 %v3349_v41, %v3649_v22 }
 0xc5a   :  { %v1470_v47 = vadd.f32 %v1468_v42, %v3658_v33 }
 0xc5b   :  { %1372 = vrot.lane.b32.xlu0 %v1369_v44, %s3500_s3  ;;  %v1471_v48 = vadd.f32 %v1469_v45, %v3658_v33  ;;  %v1370_v56 = vmul.f32 %v1369_v44, %v3865_v52 }
 0xc5c   :  { %1482 = vrot.lane.b32.xlu1 %v1470_v47, %s3500_s3  ;;  %v1478_v2 = vmul.f32 %v1474_v49, %v1470_v47 }
 0xc5d   :  { %v1479_v6 = vmul.f32 %v1475_v55, %v1471_v48 }
 0xc5f   :  { %1484 = vrot.lane.b32.xlu0 %v1471_v48, %s3500_s3 }
 0xccd   :  { %v1373_v51 = vpop.permute.xlu0 %1372 }
 0xcce   :  { %v1375_v53 = vmul.f32 %v1373_v51, %v1369_v44  ;;  %v1483_v46 = vpop.permute.xlu1 %1482 }
 0xccf   :  { %v1488_v59 = vmul.f32 %v1483_v46, %v1470_v47 }
 0xcd0   :  { %1377 = vrot.lane.b32.xlu1 %v1375_v53, %s3501_s13 }
 0xcd1   :  { %1492 = vrot.lane.b32.xlu0 %v1488_v59, %s3501_s13  ;;  %v1485_v43 = vpop.permute.xlu0 %1484 }
 0xcd2   :  { %v1489_v61 = vmul.f32 %v1485_v43, %v1471_v48 }
 0xcd4   :  { %1494 = vrot.lane.b32.xlu1 %v1489_v61, %s3501_s13 }
 0xd42   :  { %v1378_v3 = vpop.permute.xlu1 %1377 }
 0xd43   :  { %v1493_v60 = vpop.permute.xlu0 %1492  ;;  %v3922_v62 = vadd.f32 %v1378_v3, %v1370_v56 }
 0xd44   :  { %v3924_v5 = vadd.f32 %v1493_v60, %v1478_v2 }
 0xd45   :  { %3350 = vtanh.f32 %v3922_v62 }
 0xd46   :  { %3352 = vtanh.f32 %v3924_v5  ;;  %v1495_v7 = vpop.permute.xlu1 %1494  ;;  %v1775_v55 = vrot.slane %v3924_v5, 7 }
 0xd47   :  { %v3928_v10 = vadd.f32 %v1495_v7, %v1479_v6 }
 0xd49   :  { %3354 = vtanh.f32 %v3928_v10 }
 0xd4f   :  { %v3351_v52 = vpop.eup %3350 }
 0xd50   :  { %v3353_v63 = vpop.eup %3352  ;;  %1383 = vrot.lane.b32.xlu0 %v3351_v52, %s3500_s3  ;;  %v1776_v52 = vrot.slane %v3928_v10, 7 }
 0xd51   :  { %1504 = vrot.lane.b32.xlu1 %v3353_v63, %s3500_s3 }
 0xd53   :  { %v3355_v4 = vpop.eup %3354 }
 0xd54   :  { %1506 = vrot.lane.b32.xlu0 %v3355_v4, %s3500_s3 }
 0xdc2   :  { %v1384_v11 = vpop.permute.xlu0 %1383 }
 0xdc3   :  { %v1386_v13 = vmul.f32 %v1384_v11, %v1369_v44  ;;  %v1505_v14 = vpop.permute.xlu1 %1504 }
 0xdc4   :  { %v1510_v15 = vmul.f32 %v1505_v14, %v1470_v47 }
 0xdc5   :  { %1513 = vrot.lane.b32.xlu1 %v1386_v13, %s3501_s13 }
 0xdc6   :  { %v1507_v16 = vpop.permute.xlu0 %1506  ;;  %v1589_v18 = vrot.slane %v1510_v15, 4 }
 0xdc7   :  { %v1511_v17 = vmul.f32 %v1507_v16, %v1471_v48 }
 0xdc9   :  { %v1590_v21 = vrot.slane %v1511_v17, 3 }
 0xdcb   :  { %v1591_v23 = vsel %vm382_vm5, %v1590_v21, %v1589_v18 }
 0xdcc   :  { %1592 = vrot.lane.b32.xlu0 %v1591_v23, %s3501_s13 }
 0xe37   :  { %v1514_v24 = vpop.permute.xlu1 %1513 }
 0xe38   :  { %3011 = vmatmul.mubr.msk.f32.vlgmr.msra.gmra.mrb[14].mxu0 %vm187_vm6, %v1514_v24 }
 0xe39   :  { %3230 = vmatpush3.bf16.msra.mxu0 %v3614_v8  ;;  %3032 = vmatprep.mubr.msk.f32.mxu0 %vm3497_vm0, %v3498_v1 }
 0xe3a   :  { %3231 = vmatprep.subr.bf16.mxu0 %v3496_v0 }
 0xe3d   :  { %3233 = vmatpush3.bf16.msra.mxu0 %v3624_v12 }
 0xe3e   :  { %v1593_v25 = vpop.permute.xlu0 %1592  ;;  %3240 = vmatprep.subr.bf16.mxu0 %v3496_v0 }
 0xe3f   :  { %3022 = vmatmul.mubr.msk.f32.vlgmr.msra.gmra.mrb[14].mxu1 %vm187_vm6, %v1593_v25 }
 0xe40   :  { %3033 = vmatmul.mubr.msk.f32.vlgmr.msra.gmra.mrb[16].mxu0 %vm187_vm6, %v1593_v25  ;;  %3236 = vmatpush3.bf16.msra.mxu1 %v3682_v50 }
 0xe41   :  { %3237 = vmatprep.subr.bf16.mxu1 %v3496_v0  ;;  %3043 = vmatprep.mubr.msk.f32.mxu1 %vm3497_vm0, %v3498_v1 }
 0xe42   :  { %3242 = vmatpush3.bf16.msra.mxu0 %v3687_v54  ;;  %3054 = vmatprep.mubr.msk.f32.mxu0 %vm3497_vm0, %v3498_v1 }
 0xe43   :  { %3243 = vmatprep.subr.bf16.mxu0 %v3496_v0 }
 0xe44   :  { %3239 = vmatpush3.bf16.msra.mxu1 %v3690_v57 }
 0xe45   :  { %3246 = vmatprep.subr.bf16.mxu1 %v3496_v0 }
 0xe46   :  { %3245 = vmatpush3.bf16.msra.mxu0 %v3694_v58 }
 0xe47   :  { %3252 = vmatprep.subr.bf16.mxu0 %v3496_v0 }
 0xf0b   :  { %v1583_v26 = vpop.f32.mrb[14].mxu0 }
 0xf0c   :  { %v3012_v27 = vpop.f32.mrb[15].mxu0 }
 0xf12   :  { %v1662_v28 = vpop.f32.mrb[14].mxu1 }
 0xf13   :  { %v1663_v29 = vadd.f32 %v1662_v28, %v1583_v26  ;;  %v1754_v30 = vpop.f32.mrb[16].mxu0  ;;  %v3023_v31 = vpop.f32.mrb[15].mxu1 }
 0xf14   :  { %v1759_v32 = vrot.slane %v1754_v30, 3  ;;  %v1760_v34 = vrot.slane %v1754_v30, 4  ;;  %v3034_v35 = vpop.f32.mrb[17].mxu0 }
 0xf15   :  { %v1666_v36 = vadd.f32 %v3729_v9, %v1663_v29 }
 0xf16   :  { %v1763_v37 = vadd.f32 %v1759_v32, %v3643_v19  ;;  %v1764_v38 = vadd.f32 %v1760_v34, %v3645_v20 }
 0xf17   :  { %v1667_v39 = vmul.f32 %v1666_v36, %v3649_v22 }
 0xf18   :  { %v1765_v40 = vmul.f32 %v1763_v37, %v3649_v22  ;;  %v1766_v41 = vmul.f32 %v1764_v38, %v3649_v22 }
 0xf19   :  { %3356 = vtanh.f32 %v1667_v39 }
 0xf1a   :  { %3358 = vtanh.f32 %v1765_v40 }
 0xf1b   :  { %3360 = vtanh.f32 %v1766_v41 }
 0xf23   :  { %v3357_v42 = vpop.eup %3356 }
 0xf24   :  { %v3359_v44 = vpop.eup %3358  ;;  %v1669_v45 = vmul.f32 %v3357_v42, %v3649_v22 }
 0xf25   :  { %v3361_v47 = vpop.eup %3360  ;;  %v1769_v48 = vmul.f32 %v3359_v44, %v3649_v22 }
 0xf26   :  { %v1670_v51 = vadd.f32 %v1669_v45, %v3658_v33  ;;  %v1770_v53 = vmul.f32 %v3361_v47, %v3649_v22 }
 0xf27   :  { %v1771_v46 = vadd.f32 %v1769_v48, %v3658_v33 }
 0xf28   :  { %1673 = vrot.lane.b32.xlu1 %v1670_v51, %s3500_s3  ;;  %v1772_v59 = vadd.f32 %v1770_v53, %v3658_v33  ;;  %v1671_v60 = vmul.f32 %v1670_v51, %v3922_v62 }
 0xf29   :  { %1783 = vrot.lane.b32.xlu0 %v1771_v46, %s3500_s3  ;;  %v1779_v7 = vmul.f32 %v1775_v55, %v1771_v46 }
 0xf2a   :  { %v1780_v13 = vmul.f32 %v1776_v52, %v1772_v59 }
 0xf2c   :  { %1785 = vrot.lane.b32.xlu1 %v1772_v59, %s3500_s3 }
 0xf9a   :  { %v1674_v43 = vpop.permute.xlu1 %1673 }
 0xf9b   :  { %v1784_v61 = vpop.permute.xlu0 %1783  ;;  %v1676_v49 = vmul.f32 %v1674_v43, %v1670_v51 }
 0xf9c   :  { %v1789_v56 = vmul.f32 %v1784_v61, %v1771_v46 }
 0xf9d   :  { %1678 = vrot.lane.b32.xlu0 %v1676_v49, %s3501_s13 }
 0xf9e   :  { %1793 = vrot.lane.b32.xlu1 %v1789_v56, %s3501_s13  ;;  %v1786_v2 = vpop.permute.xlu1 %1785 }
 0xf9f   :  { %v1790_v3 = vmul.f32 %v1786_v2, %v1772_v59 }
 0xfa1   :  { %1795 = vrot.lane.b32.xlu0 %v1790_v3, %s3501_s13 }
0x100f   :  { %v1679_v6 = vpop.permute.xlu0 %1678 }
0x1010   :  { %v3979_v63 = vadd.f32 %v1679_v6, %v1671_v60  ;;  %v1794_v4 = vpop.permute.xlu1 %1793 }
0x1011   :  { %v3981_v11 = vadd.f32 %v1794_v4, %v1779_v7 }
0x1012   :  { %3362 = vtanh.f32 %v3979_v63 }
0x1013   :  { %3364 = vtanh.f32 %v3981_v11  ;;  %v1796_v14 = vpop.permute.xlu0 %1795  ;;  %v2076_v7 = vrot.slane %v3981_v11, 7 }
0x1014   :  { %v3985_v15 = vadd.f32 %v1796_v14, %v1780_v13 }
0x1016   :  { %3366 = vtanh.f32 %v3985_v15  ;;  %v2077_v14 = vrot.slane %v3985_v15, 7 }
0x101c   :  { %v3363_v62 = vpop.eup %3362 }
0x101d   :  { %v3365_v5 = vpop.eup %3364  ;;  %1684 = vrot.lane.b32.xlu1 %v3363_v62, %s3500_s3 }
0x101e   :  { %1805 = vrot.lane.b32.xlu0 %v3365_v5, %s3500_s3 }
0x1020   :  { %v3367_v10 = vpop.eup %3366 }
0x1021   :  { %1807 = vrot.lane.b32.xlu1 %v3367_v10, %s3500_s3 }
0x108f   :  { %v1685_v16 = vpop.permute.xlu1 %1684 }
0x1090   :  { %v1806_v17 = vpop.permute.xlu0 %1805  ;;  %v1687_v18 = vmul.f32 %v1685_v16, %v1670_v51 }
0x1091   :  { %v1811_v21 = vmul.f32 %v1806_v17, %v1771_v46 }
0x1092   :  { %1814 = vrot.lane.b32.xlu0 %v1687_v18, %s3501_s13 }
0x1093   :  { %v1808_v23 = vpop.permute.xlu1 %1807  ;;  %v1890_v25 = vrot.slane %v1811_v21, 5 }
0x1094   :  { %v1812_v24 = vmul.f32 %v1808_v23, %v1772_v59 }
0x1096   :  { %v1891_v26 = vrot.slane %v1812_v24, 4 }
0x1098   :  { %v1892_v27 = vsel %vm382_vm5, %v1891_v26, %v1890_v25 }
0x1099   :  { %1893 = vrot.lane.b32.xlu1 %v1892_v27, %s3501_s13 }
0x1104   :  { %v1815_v28 = vpop.permute.xlu0 %1814 }
0x1105   :  { %3044 = vmatmul.mubr.msk.f32.vlgmr.msra.gmra.mrb[16].mxu1 %vm187_vm6, %v1815_v28 }
0x1106   :  { %3248 = vmatpush3.bf16.msra.mxu1 %v3614_v8  ;;  %3065 = vmatprep.mubr.msk.f32.mxu1 %vm3497_vm0, %v3498_v1 }
0x1107   :  { %3249 = vmatprep.subr.bf16.mxu1 %v3496_v0 }
0x110a   :  { %3251 = vmatpush3.bf16.msra.mxu1 %v3624_v12 }
0x110b   :  { %v1894_v29 = vpop.permute.xlu1 %1893  ;;  %3258 = vmatprep.subr.bf16.mxu1 %v3496_v0 }
0x110c   :  { %3055 = vmatmul.mubr.msk.f32.vlgmr.msra.gmra.mrb[18].mxu0 %vm187_vm6, %v1894_v29 }
0x110d   :  { %3066 = vmatmul.mubr.msk.f32.vlgmr.msra.gmra.mrb[18].mxu1 %vm187_vm6, %v1894_v29  ;;  %3254 = vmatpush3.bf16.msra.mxu0 %v3682_v50 }
0x110e   :  { %3255 = vmatprep.subr.bf16.mxu0 %v3496_v0  ;;  %3076 = vmatprep.mubr.msk.f32.mxu0 %vm3497_vm0, %v3498_v1 }
0x110f   :  { %3260 = vmatpush3.bf16.msra.mxu1 %v3687_v54  ;;  %3087 = vmatprep.mubr.msk.f32.mxu1 %vm3497_vm0, %v3498_v1 }
0x1110   :  { %3261 = vmatprep.subr.bf16.mxu1 %v3496_v0 }
0x1111   :  { %3257 = vmatpush3.bf16.msra.mxu0 %v3690_v57 }
0x1112   :  { %3264 = vmatprep.subr.bf16.mxu0 %v3496_v0 }
0x1113   :  { %3263 = vmatpush3.bf16.msra.mxu1 %v3694_v58 }
0x1114   :  { %3270 = vmatprep.subr.bf16.mxu1 %v3496_v0 }
0x11d8   :  { %v1884_v30 = vpop.f32.mrb[16].mxu1 }
0x11d9   :  { %v3045_v31 = vpop.f32.mrb[17].mxu1 }
0x11df   :  { %v1963_v32 = vpop.f32.mrb[18].mxu0 }
0x11e0   :  { %v1964_v34 = vadd.f32 %v1963_v32, %v1884_v30  ;;  %v2055_v35 = vpop.f32.mrb[18].mxu1  ;;  %v3056_v36 = vpop.f32.mrb[19].mxu0 }
0x11e1   :  { %v2060_v37 = vrot.slane %v2055_v35, 2  ;;  %v2061_v38 = vrot.slane %v2055_v35, 3  ;;  %v3067_v39 = vpop.f32.mrb[19].mxu1 }
0x11e2   :  { %v1967_v40 = vadd.f32 %v3729_v9, %v1964_v34  ;;  %v4074_v39 = vld [vmem:[%s4150_s6] ss:$0 sm:$0xff] }
0x11e3   :  { %v2064_v41 = vadd.f32 %v2060_v37, %v3643_v19  ;;  %v2065_v42 = vadd.f32 %v2061_v38, %v3645_v20 }
0x11e4   :  { %v1968_v44 = vmul.f32 %v1967_v40, %v3649_v22 }
0x11e5   :  { %v2066_v45 = vmul.f32 %v2064_v41, %v3649_v22  ;;  %v2067_v47 = vmul.f32 %v2065_v42, %v3649_v22 }
0x11e6   :  { %3368 = vtanh.f32 %v1968_v44 }
0x11e7   :  { %3370 = vtanh.f32 %v2066_v45 }
0x11e8   :  { %3372 = vtanh.f32 %v2067_v47 }
0x11f0   :  { %v3369_v48 = vpop.eup %3368 }
0x11f1   :  { %v3371_v51 = vpop.eup %3370  ;;  %v1970_v53 = vmul.f32 %v3369_v48, %v3649_v22 }
0x11f2   :  { %v3373_v46 = vpop.eup %3372  ;;  %v2070_v9 = vmul.f32 %v3371_v51, %v3649_v22 }
0x11f3   :  { %v1971_v59 = vadd.f32 %v1970_v53, %v3658_v33  ;;  %v2071_v43 = vmul.f32 %v3373_v46, %v3649_v22 }
0x11f4   :  { %v2072_v61 = vadd.f32 %v2070_v9, %v3658_v33 }
0x11f5   :  { %1974 = vrot.lane.b32.xlu0 %v1971_v59, %s3500_s3  ;;  %v2073_v49 = vadd.f32 %v2071_v43, %v3658_v33  ;;  %v1972_v52 = vmul.f32 %v1971_v59, %v3979_v63 }
0x11f6   :  { %2084 = vrot.lane.b32.xlu1 %v2072_v61, %s3500_s3  ;;  %v2080_v4 = vmul.f32 %v2076_v7, %v2072_v61 }
0x11f7   :  { %v2081_v16 = vmul.f32 %v2077_v14, %v2073_v49 }
0x11f9   :  { %2086 = vrot.lane.b32.xlu0 %v2073_v49, %s3500_s3 }
0x1267   :  { %v1975_v56 = vpop.permute.xlu0 %1974 }
0x1268   :  { %v1977_v2 = vmul.f32 %v1975_v56, %v1971_v59  ;;  %v2085_v3 = vpop.permute.xlu1 %2084 }
0x1269   :  { %v2090_v55 = vmul.f32 %v2085_v3, %v2072_v61 }
0x126a   :  { %1979 = vrot.lane.b32.xlu1 %v1977_v2, %s3501_s13 }
0x126b   :  { %2094 = vrot.lane.b32.xlu0 %v2090_v55, %s3501_s13  ;;  %v2087_v60 = vpop.permute.xlu0 %2086 }
0x126c   :  { %v2091_v6 = vmul.f32 %v2087_v60, %v2073_v49 }
0x126e   :  { %2096 = vrot.lane.b32.xlu1 %v2091_v6, %s3501_s13 }
0x12dc   :  { %v1980_v13 = vpop.permute.xlu1 %1979 }
0x12dd   :  { %v2095_v62 = vpop.permute.xlu0 %2094  ;;  %v4036_v5 = vadd.f32 %v1980_v13, %v1972_v52 }
0x12de   :  { %v4038_v10 = vadd.f32 %v2095_v62, %v2080_v4 }
0x12df   :  { %3374 = vtanh.f32 %v4036_v5 }
0x12e0   :  { %3376 = vtanh.f32 %v4038_v10  ;;  %v2097_v17 = vpop.permute.xlu1 %2096  ;;  %v2377_v3 = vrot.slane %v4038_v10, 7 }
0x12e1   :  { %v4042_v18 = vadd.f32 %v2097_v17, %v2081_v16 }
0x12e3   :  { %3378 = vtanh.f32 %v4042_v18  ;;  %v2378_v55 = vrot.slane %v4042_v18, 7 }
0x12e9   :  { %v3375_v63 = vpop.eup %3374 }
0x12ea   :  { %v3377_v11 = vpop.eup %3376  ;;  %1985 = vrot.lane.b32.xlu0 %v3375_v63, %s3500_s3 }
0x12eb   :  { %2106 = vrot.lane.b32.xlu1 %v3377_v11, %s3500_s3 }
0x12ed   :  { %v3379_v15 = vpop.eup %3378 }
0x12ee   :  { %2108 = vrot.lane.b32.xlu0 %v3379_v15, %s3500_s3 }
0x135c   :  { %v1986_v21 = vpop.permute.xlu0 %1985 }
0x135d   :  { %v1988_v23 = vmul.f32 %v1986_v21, %v1971_v59  ;;  %v2107_v24 = vpop.permute.xlu1 %2106 }
0x135e   :  { %v2112_v25 = vmul.f32 %v2107_v24, %v2072_v61 }
0x135f   :  { %2115 = vrot.lane.b32.xlu1 %v1988_v23, %s3501_s13 }
0x1360   :  { %v2109_v26 = vpop.permute.xlu0 %2108  ;;  %v2191_v28 = vrot.slane %v2112_v25, 6 }
0x1361   :  { %v2113_v27 = vmul.f32 %v2109_v26, %v2073_v49 }
0x1363   :  { %v2192_v29 = vrot.slane %v2113_v27, 5 }
0x1365   :  { %v2193_v30 = vsel %vm382_vm5, %v2192_v29, %v2191_v28 }
0x1366   :  { %2194 = vrot.lane.b32.xlu0 %v2193_v30, %s3501_s13 }
0x13d1   :  { %v2116_v31 = vpop.permute.xlu1 %2115 }
0x13d2   :  { %3077 = vmatmul.mubr.msk.f32.vlgmr.msra.gmra.mrb[20].mxu0 %vm187_vm6, %v2116_v31 }
0x13d3   :  { %3266 = vmatpush3.bf16.msra.mxu0 %v3614_v8  ;;  %3098 = vmatprep.mubr.msk.f32.mxu0 %vm3497_vm0, %v3498_v1 }
0x13d4   :  { %3267 = vmatprep.subr.bf16.mxu0 %v3496_v0 }
0x13d7   :  { %3269 = vmatpush3.bf16.msra.mxu0 %v3624_v12 }
0x13d8   :  { %v2195_v32 = vpop.permute.xlu0 %2194  ;;  %3276 = vmatprep.subr.bf16.mxu0 %v3496_v0 }
0x13d9   :  { %3088 = vmatmul.mubr.msk.f32.vlgmr.msra.gmra.mrb[20].mxu1 %vm187_vm6, %v2195_v32 }
0x13da   :  { %3099 = vmatmul.mubr.msk.f32.vlgmr.msra.gmra.mrb[22].mxu0 %vm187_vm6, %v2195_v32  ;;  %3272 = vmatpush3.bf16.msra.mxu1 %v3682_v50 }
0x13db   :  { %3278 = vmatpush3.bf16.msra.mxu0 %v3687_v54  ;;  %3273 = vmatprep.subr.bf16.mxu1 %v3496_v0 }
0x13dc   :  { %3279 = vmatprep.subr.bf16.mxu0 %v3496_v0  ;;  %3120 = vmatprep.mubr.msk.f32.mxu0 %vm3497_vm0, %v3498_v1 }
0x13dd   :  { %3109 = vmatprep.mubr.msk.f32.mxu1 %vm3497_vm0, %v3498_v1 }
0x13de   :  { %3275 = vmatpush3.bf16.msra.mxu1 %v3690_v57 }
0x13df   :  { %3281 = vmatpush3.bf16.msra.mxu0 %v3694_v58  ;;  %3282 = vmatprep.subr.bf16.mxu1 %v3496_v0 }
0x14a5   :  { %v2185_v8 = vpop.f32.mrb[20].mxu0 }
0x14a6   :  { %v3078_v12 = vpop.f32.mrb[21].mxu0 }
0x14ac   :  { %v2264_v50 = vpop.f32.mrb[20].mxu1 }
0x14ad   :  { %v2265_v54 = vadd.f32 %v2264_v50, %v2185_v8  ;;  %v2356_v34 = vpop.f32.mrb[22].mxu0  ;;  %v3089_v35 = vpop.f32.mrb[21].mxu1 }
0x14ae   :  { %v2361_v36 = vrot.slane %v2356_v34, 1  ;;  %v2362_v37 = vrot.slane %v2356_v34, 2  ;;  %v3100_v38 = vpop.f32.mrb[23].mxu0 }
0x14af   :  { %v2268_v57 = vadd.f32 %v4074_v39, %v2265_v54 }
0x14b0   :  { %v2365_v58 = vadd.f32 %v2361_v36, %v3643_v19  ;;  %v2366_v40 = vadd.f32 %v2362_v37, %v3645_v20 }
0x14b1   :  { %v2269_v41 = vmul.f32 %v2268_v57, %v3649_v22 }
0x14b2   :  { %v2367_v42 = vmul.f32 %v2365_v58, %v3649_v22  ;;  %v2368_v44 = vmul.f32 %v2366_v40, %v3649_v22  ;;  %v2594_v40 = vld [vmem:[%s4151_s7 + $0x18] sm:$0xff] }
0x14b3   :  { %3380 = vtanh.f32 %v2269_v41 }
0x14b4   :  { %3382 = vtanh.f32 %v2367_v42 }
0x14b5   :  { %3384 = vtanh.f32 %v2368_v44 }
0x14bd   :  { %v3381_v45 = vpop.eup %3380 }
0x14be   :  { %v3383_v47 = vpop.eup %3382  ;;  %v2271_v20 = vmul.f32 %v3381_v45, %v3649_v22 }
0x14bf   :  { %v3385_v48 = vpop.eup %3384  ;;  %v2371_v51 = vmul.f32 %v3383_v47, %v3649_v22 }
0x14c0   :  { %v2372_v53 = vmul.f32 %v3385_v48, %v3649_v22  ;;  %v2272_v9 = vadd.f32 %v2271_v20, %v3658_v33  ;;  %v2721_v48 = vld [vmem:[%s4152_s8] ss:$0 sm:$0xff] }
0x14c1   :  { %v2373_v19 = vadd.f32 %v2371_v51, %v3658_v33 }
0x14c2   :  { %v2374_v46 = vadd.f32 %v2372_v53, %v3658_v33  ;;  %v2273_v14 = vmul.f32 %v2272_v9, %v4036_v5 }
0x14c3   :  { %2385 = vrot.lane.b32.xlu1 %v2373_v19, %s3500_s3  ;;  %v2381_v60 = vmul.f32 %v2377_v3, %v2373_v19 }
0x14c4   :  { %2387 = vrot.lane.b32.xlu0 %v2374_v46, %s3500_s3  ;;  %v2382_v7 = vmul.f32 %v2378_v55, %v2374_v46 }
0x14c7   :  { %2275 = vrot.lane.b32.xlu1 %v2272_v9, %s3500_s3 }
0x1535   :  { %v2386_v59 = vpop.permute.xlu1 %2385 }
0x1536   :  { %v2388_v43 = vpop.permute.xlu0 %2387  ;;  %v2391_v61 = vmul.f32 %v2386_v59, %v2373_v19 }
0x1537   :  { %v2392_v49 = vmul.f32 %v2388_v43, %v2374_v46 }
0x1538   :  { %2395 = vrot.lane.b32.xlu0 %v2391_v61, %s3501_s13 }
0x1539   :  { %2397 = vrot.lane.b32.xlu1 %v2392_v49, %s3501_s13  ;;  %v2276_v56 = vpop.permute.xlu1 %2275 }
0x153a   :  { %v2278_v2 = vmul.f32 %v2276_v56, %v2272_v9 }
0x153c   :  { %2280 = vrot.lane.b32.xlu0 %v2278_v2, %s3501_s13 }
0x15aa   :  { %v2396_v6 = vpop.permute.xlu0 %2395 }
0x15ab   :  { %v2401_v52 = vadd.f32 %v2396_v6, %v2381_v60  ;;  %v2398_v4 = vpop.permute.xlu1 %2397 }
0x15ac   :  { %v2402_v13 = vadd.f32 %v2398_v4, %v2382_v7 }
0x15ad   :  { %3386 = vtanh.f32 %v2401_v52 }
0x15ae   :  { %3388 = vtanh.f32 %v2402_v13  ;;  %v2281_v62 = vpop.permute.xlu0 %2280 }
0x15af   :  { %v2283_v16 = vadd.f32 %v2281_v62, %v2273_v14 }
0x15b1   :  { %3390 = vtanh.f32 %v2283_v16 }
0x15b7   :  { %v3387_v17 = vpop.eup %3386 }
0x15b8   :  { %v3389_v63 = vpop.eup %3388  ;;  %2407 = vrot.lane.b32.xlu1 %v3387_v17, %s3500_s3 }
0x15b9   :  { %2409 = vrot.lane.b32.xlu0 %v3389_v63, %s3500_s3 }
0x15bb   :  { %v3391_v10 = vpop.eup %3390 }
0x15bc   :  { %2286 = vrot.lane.b32.xlu1 %v3391_v10, %s3500_s3 }
0x162a   :  { %v2408_v18 = vpop.permute.xlu1 %2407 }
0x162b   :  { %v2410_v11 = vpop.permute.xlu0 %2409  ;;  %v2413_v15 = vmul.f32 %v2408_v18, %v2373_v19 }
0x162c   :  { %v2414_v21 = vmul.f32 %v2410_v11, %v2374_v46 }
0x162d   :  { %v2492_v23 = vrot.slane %v2413_v15, 7 }
0x162e   :  { %v2493_v24 = vrot.slane %v2414_v21, 6  ;;  %v2287_v5 = vpop.permute.xlu1 %2286 }
0x162f   :  { %v2289_v25 = vmul.f32 %v2287_v5, %v2272_v9 }
0x1630   :  { %v2494_v26 = vsel %vm382_vm5, %v2493_v24, %v2492_v23 }
0x1631   :  { %2495 = vrot.lane.b32.xlu1 %v2494_v26, %s3501_s13  ;;  %2416 = vrot.lane.b32.xlu0 %v2289_v25, %s3501_s13 }
0x16a3   :  { %v2496_v27 = vpop.permute.xlu1 %2495  ;;  %v2417_v28 = vpop.permute.xlu0 %2416 }
0x16a4   :  { %3121 = vmatmul.mubr.msk.f32.vlgmr.msra.gmra.mrb[24].mxu0 %vm187_vm6, %v2496_v27  ;;  %3110 = vmatmul.mubr.msk.f32.vlgmr.msra.gmra.mrb[22].mxu1 %vm187_vm6, %v2417_v28 }
0x16a5   :  { %3131 = vmatprep.mubr.msk.f32.mxu1 %vm3497_vm0, %v3498_v1 }
0x1777   :  { %v2565_v29 = vpop.f32.mrb[24].mxu0  ;;  %v2486_v30 = vpop.f32.mrb[22].mxu1 }
0x1778   :  { %v2566_v31 = vadd.f32 %v2565_v29, %v2486_v30  ;;  %v3122_v32 = vpop.f32.mrb[25].mxu0  ;;  %v3111_v8 = vpop.f32.mrb[23].mxu1 }
0x177a   :  { %v2569_v12 = vadd.f32 %v4074_v39, %v2566_v31  ;;  %v2591_v39 = vld [vmem:[%s4151_s7] sm:$0xff] }
0x177c   :  { %v2570_v50 = vmul.f32 %v2569_v12, %v3649_v22 }
0x177e   :  { %3392 = vtanh.f32 %v2570_v50 }
0x1788   :  { %v3393_v54 = vpop.eup %3392 }
0x1789   :  { %v2572_v34 = vmul.f32 %v3393_v54, %v3649_v22  ;;  %v2592_v22 = vld [vmem:[%s4151_s7 + $0x8] sm:$0xff] }
0x178a   :  { %v3283_v58 = vpack.c.bf16 %v2592_v22, %v2591_v39 }
0x178b   :  { %v2573_v35 = vadd.f32 %v2572_v34, %v3658_v33  ;;  %v2593_v33 = vld [vmem:[%s4151_s7 + $0x10] sm:$0xff]  ;;  %s3502_s7 = smov [#allocation8]  }
0x178c   :  { %3284 = vmatpush3.bf16.msra.mxu1 %v3283_v58  ;;  %v3286_v41 = vpack.c.bf16 %v2594_v40, %v2593_v33  ;;  %s2685_s29 = sshll.u32 %s3502_s7, 4  ;;  %s2686_s29 = int_to_ptr.vmem [resolvable:$true] %s2685_s29 }
0x178d   :  { %2576 = vrot.lane.b32.xlu0 %v2573_v35, %s3500_s3  ;;  %v2574_v1 = vmul.f32 %v2573_v35, %v2283_v16  ;;  %3285 = vmatprep.subr.bf16.mxu1 %v3496_v0  ;;  %s3463_s30 = scalar_lea.vmem %s2686_s29, 32  ;;  %p3468_p11 = scmp.lt.s32.totalorder %s2686_s29, %s2686_s29 }
0x178e   :  { %p3464_p10 = scmp.ne.s32.totalorder %s2686_s29, %s3463_s30  ;;  %p3469_p12 = scmp.lt.s32.totalorder %s3463_s30, %s3463_s30 }
0x1790   :  { %3287 = vmatpush3.bf16.msra.mxu1 %v3286_v41  ;;  %p3470_p13 = por %p3469_p12, %p3468_p11 }
0x1792   :  { %p3471_p0 = pnand %p3470_p13, %p3464_p10 }
0x17ff   :  { %v2577_v36 = vpop.permute.xlu0 %2576 }
0x1800   :  { %v2579_v37 = vmul.f32 %v2577_v36, %v2573_v35 }
0x1802   :  { %2581 = vrot.lane.b32.xlu1 %v2579_v37, %s3501_s13 }
0x1874   :  { %v2582_v38 = vpop.permute.xlu1 %2581 }
0x1875   :  { %v2584_v57 = vadd.f32 %v2582_v38, %v2574_v1 }
0x1877   :  { %3394 = vtanh.f32 %v2584_v57 }
0x1881   :  { %v3395_v42 = vpop.eup %3394 }
0x1882   :  { %2587 = vrot.lane.b32.xlu0 %v3395_v42, %s3500_s3 }
0x18f4   :  { %v2588_v44 = vpop.permute.xlu0 %2587 }
0x18f5   :  { %v2590_v45 = vmul.f32 %v2588_v44, %v2573_v35 }
0x18f7   :  { %2603 = vrot.lane.b32.xlu1 %v2590_v45, %s3501_s13 }
0x1969   :  { %v2604_v47 = vpop.permute.xlu1 %2603 }
0x196a   :  { %3132 = vmatmul.mubr.msk.f32.vlgmr.msra.gmra.mrb[24].mxu1 %vm187_vm6, %v2604_v47 }
0x1a3d   :  { %v2673_v51 = vpop.f32.mrb[24].mxu1 }
0x1a3e   :  { %v2674_v0 = vadd.f32 %v2721_v48, %v2673_v51  ;;  %v3133_v53 = vpop.f32.mrb[25].mxu1 }
0x1a40   :  { %2678 = vst.msk [vmem:[#allocation8] sm:$0x3] %vm2677_vm7, %v2674_v0 }
0x1a41   :  { %3474 = shalt.err (!%p3471_p0)
}
0x1a42   :  { %s3475_s3 = scalar_lea.hbm %s4153_s9, 32 }
0x1a43   :  { %p3476_p1 = scmp.ne.s32.totalorder %s4153_s9, %s3475_s3  ;;  %p3479_p2 = scmp.lt.u32.totalorder %s3475_s3, %s4153_s9 }
0x1a45   :  { %p3481_p3 = pnand %p3479_p2, %p3476_p1 }
0x1a47   :  { %3484 = shalt.err (!%p3481_p3)
}
0x1a48   :  { %2688 = dma.vmem_to_hbm [thread:$0]  %s2686_s29, 32, %s4153_s9, [#allocation4]  }
0x1a49   :  { %3489 = dma.done.wait [#allocation4], 32  }
0x1a4a   :  { %3490 = vsyncadd [#allocation4], 4294967264 }
0x1a4b   :  { %2692 = vsyncpa [#allocation3], 1 }
0x1a4c   :  { %2693 = vsyncpa [#allocation6], 1 }
0x1a4d   :  { %2694 = vsyncpa [#allocation4], 1 }

</bundles_post_ra>
